<compile_context>
chip_gen: v7x
topology: tpu7x:2x2x1
jax: 0.10.0
libtpu: 0.0.40
codegen_flags: <defaults>
</compile_context>

<pallas_src>
import math
from functools import partial

import jax
import jax.numpy as jnp
from jax import lax
from jax.experimental import pallas as pl
from jax.experimental.pallas import tpu as pltpu

_NEG_INF = -1e30  # finite "minus infinity" so online softmax never produces NaN


def _round_up(x, m):
    return (x + m - 1) // m * m


def _pad2(x, rows, cols):
    r, c = x.shape
    if r == rows and c == cols:
        return x
    return jnp.pad(x, ((0, rows - r), (0, cols - c)))


# --------------------------------------------------------------------------
# Tiled linear: y = act(x @ W + b)   (bf16 out by default, f32 acc scratch)
# --------------------------------------------------------------------------
def _linear_kernel(x_ref, w_ref, b_ref, o_ref, acc_ref, *, activation):
    @pl.when(pl.program_id(2) == 0)
    def _():
        acc_ref[...] = jnp.zeros_like(acc_ref)

    acc_ref[...] += jnp.dot(x_ref[...], w_ref[...],
                            preferred_element_type=jnp.float32)

    @pl.when(pl.program_id(2) == pl.num_programs(2) - 1)
    def _():
        y = acc_ref[...] + b_ref[...]
        if activation == "relu":
            y = jnp.maximum(y, 0.0)
        o_ref[...] = y.astype(o_ref.dtype)


def linear(x, w, b, activation=None, out_dtype=jnp.bfloat16):
    """x: (M, K), w: (K, N) bf16, b: (N,) f32 -> (M, N) out_dtype."""
    M, K = x.shape
    N = w.shape[1]
    tm = min(512, _round_up(M, 16))
    tn = min(512, _round_up(N, 128))
    tk = min(1024, _round_up(K, 128))
    Mp, Kp, Np = _round_up(M, tm), _round_up(K, tk), _round_up(N, tn)

    xp = _pad2(x, Mp, Kp).astype(jnp.bfloat16)
    wp = _pad2(w, Kp, Np).astype(jnp.bfloat16)
    bp = _pad2(b.reshape(1, N).astype(jnp.float32), 1, Np)

    out = pl.pallas_call(
        partial(_linear_kernel, activation=activation),
        grid=(Mp // tm, Np // tn, Kp // tk),
        in_specs=[
            pl.BlockSpec((tm, tk), lambda i, j, k: (i, k)),
            pl.BlockSpec((tk, tn), lambda i, j, k: (k, j)),
            pl.BlockSpec((1, tn), lambda i, j, k: (0, j)),
        ],
        out_specs=pl.BlockSpec((tm, tn), lambda i, j, k: (i, j)),
        out_shape=jax.ShapeDtypeStruct((Mp, Np), out_dtype),
        scratch_shapes=[pltpu.VMEM((tm, tn), jnp.float32)],
        compiler_params=pltpu.CompilerParams(
            dimension_semantics=("parallel", "parallel", "arbitrary")),
    )(xp, wp, bp)
    return out[:M, :N]


# --------------------------------------------------------------------------
# Fused matmul + bias + residual + LayerNorm (post-norm epilogue), bf16 out
# --------------------------------------------------------------------------
def _lin_res_ln_kernel(x_ref, w_ref, b_ref, r_ref, g_ref, bt_ref, o_ref, acc_ref, *, eps):
    @pl.when(pl.program_id(1) == 0)
    def _():
        acc_ref[...] = jnp.zeros_like(acc_ref)

    acc_ref[...] += jnp.dot(x_ref[...], w_ref[...],
                            preferred_element_type=jnp.float32)

    @pl.when(pl.program_id(1) == pl.num_programs(1) - 1)
    def _():
        z = acc_ref[...] + b_ref[...] + r_ref[...].astype(jnp.float32)
        mean = jnp.mean(z, axis=-1, keepdims=True)
        var = jnp.mean(jnp.square(z - mean), axis=-1, keepdims=True)
        zn = (z - mean) * lax.rsqrt(var + eps)
        o_ref[...] = (zn * g_ref[...] + bt_ref[...]).astype(o_ref.dtype)


def linear_residual_layernorm(x, w, b, res, gamma, beta, eps=1e-5):
    """LayerNorm(res + x @ w + b) over last dim. x:(M,K), w:(K,D) bf16, res:(M,D)."""
    M, K = x.shape
    D = w.shape[1]
    tm = min(256, _round_up(M, 16))
    tk = min(1024, _round_up(K, 128))
    Mp, Kp = _round_up(M, tm), _round_up(K, tk)

    xp = _pad2(x, Mp, Kp).astype(jnp.bfloat16)
    wp = _pad2(w, Kp, D).astype(jnp.bfloat16)
    rp = _pad2(res, Mp, D).astype(jnp.bfloat16)

    out = pl.pallas_call(
        partial(_lin_res_ln_kernel, eps=eps),
        grid=(Mp // tm, Kp // tk),
        in_specs=[
            pl.BlockSpec((tm, tk), lambda i, k: (i, k)),
            pl.BlockSpec((tk, D), lambda i, k: (k, 0)),
            pl.BlockSpec((1, D), lambda i, k: (0, 0)),
            pl.BlockSpec((tm, D), lambda i, k: (i, 0)),
            pl.BlockSpec((1, D), lambda i, k: (0, 0)),
            pl.BlockSpec((1, D), lambda i, k: (0, 0)),
        ],
        out_specs=pl.BlockSpec((tm, D), lambda i, k: (i, 0)),
        out_shape=jax.ShapeDtypeStruct((Mp, D), jnp.bfloat16),
        scratch_shapes=[pltpu.VMEM((tm, D), jnp.float32)],
        compiler_params=pltpu.CompilerParams(
            dimension_semantics=("parallel", "arbitrary")),
    )(xp, wp, b.reshape(1, D).astype(jnp.float32), rp,
      gamma.reshape(1, D), beta.reshape(1, D))
    return out[:M]


# --------------------------------------------------------------------------
# Plain LayerNorm (encoder / decoder final norm), bf16 out
# --------------------------------------------------------------------------
def _layernorm_kernel(x_ref, g_ref, b_ref, o_ref, *, eps):
    z = x_ref[...].astype(jnp.float32)
    mean = jnp.mean(z, axis=-1, keepdims=True)
    var = jnp.mean(jnp.square(z - mean), axis=-1, keepdims=True)
    zn = (z - mean) * lax.rsqrt(var + eps)
    o_ref[...] = (zn * g_ref[...] + b_ref[...]).astype(o_ref.dtype)


def layernorm(x, gamma, beta, eps=1e-5):
    M, D = x.shape
    tm = min(512, _round_up(M, 16))
    Mp = _round_up(M, tm)
    xp = _pad2(x, Mp, D).astype(jnp.bfloat16)
    out = pl.pallas_call(
        partial(_layernorm_kernel, eps=eps),
        grid=(Mp // tm,),
        in_specs=[
            pl.BlockSpec((tm, D), lambda i: (i, 0)),
            pl.BlockSpec((1, D), lambda i: (0, 0)),
            pl.BlockSpec((1, D), lambda i: (0, 0)),
        ],
        out_specs=pl.BlockSpec((tm, D), lambda i: (i, 0)),
        out_shape=jax.ShapeDtypeStruct((Mp, D), jnp.bfloat16),
        compiler_params=pltpu.CompilerParams(dimension_semantics=("parallel",)),
    )(xp, gamma.reshape(1, D), beta.reshape(1, D))
    return out[:M]


# --------------------------------------------------------------------------
# Flash attention, grid (B*H, q-blocks, kv-blocks), in-kernel masking, no Dh pad
# --------------------------------------------------------------------------
def _flash_attn_kernel(q_ref, k_ref, v_ref, o_ref, m_sc, l_sc, acc_sc,
                       *, causal, mask_kv, kv_len, q_blk, kv_blk):
    kv = pl.program_id(2)

    @pl.when(kv == 0)
    def _():
        m_sc[...] = jnp.full_like(m_sc, _NEG_INF)
        l_sc[...] = jnp.zeros_like(l_sc)
        acc_sc[...] = jnp.zeros_like(acc_sc)

    q = q_ref[0]                                                   # (tq, Dh) bf16 (scale pre-folded)
    k = k_ref[0]                                                   # (tkv, Dh) bf16
    s = lax.dot_general(q, k, (((1,), (1,)), ((), ())),
                        preferred_element_type=jnp.float32)        # (tq, tkv) f32

    # Masks generated in-kernel (cheap VPU iota/compare); no mask DMA.
    if causal or mask_kv:
        cols = kv * kv_blk + lax.broadcasted_iota(jnp.int32, s.shape, 1)
        invalid = None
        if causal:
            rows = pl.program_id(1) * q_blk + lax.broadcasted_iota(jnp.int32, s.shape, 0)
            invalid = cols > rows
        if mask_kv:
            kvm = cols >= kv_len
            invalid = kvm if invalid is None else (invalid | kvm)
        s = jnp.where(invalid, _NEG_INF, s)

    m_prev = m_sc[...]
    m_new = jnp.maximum(m_prev, jnp.max(s, axis=-1, keepdims=True))
    alpha = jnp.exp(m_prev - m_new)
    p = jnp.exp(s - m_new)
    l_sc[...] = alpha * l_sc[...] + jnp.sum(p, axis=-1, keepdims=True)
    acc_sc[...] = alpha * acc_sc[...] + lax.dot_general(
        p.astype(v_ref.dtype), v_ref[0], (((1,), (0,)), ((), ())),
        preferred_element_type=jnp.float32)
    m_sc[...] = m_new

    @pl.when(kv == pl.num_programs(2) - 1)
    def _():
        inv_l = pl.reciprocal(l_sc[...], approx=True)
        o_ref[0] = (acc_sc[...] * inv_l).astype(o_ref.dtype)


def flash_attention(q, k, v, *, causal=False):
    """q: (BH, Sq, Dh), k/v: (BH, Sk, Dh). Scale assumed folded into q."""
    BH, Sq, Dh = q.shape
    Sk = k.shape[1]

    tq = min(256, _round_up(Sq, 16))
    Sq_p = _round_up(Sq, tq)
    if Sk >= 128:
        tkv = min(512, _round_up(Sk, 128))
    else:
        tkv = _round_up(Sk, 16)
    Sk_p = _round_up(Sk, tkv)
    n_q = Sq_p // tq
    n_kv = Sk_p // tkv
    mask_kv = Sk_p > Sk

    def pad_s(x, s):
        _, ss, _ = x.shape
        xp = x if ss == s else jnp.pad(x, ((0, 0), (0, s - ss), (0, 0)))
        return xp.astype(jnp.bfloat16)

    qp = pad_s(q, Sq_p)
    kp = pad_s(k, Sk_p)
    vp = pad_s(v, Sk_p)

    out = pl.pallas_call(
        partial(_flash_attn_kernel, causal=causal, mask_kv=mask_kv,
                kv_len=Sk, q_blk=tq, kv_blk=tkv),
        grid=(BH, n_q, n_kv),
        in_specs=[
            pl.BlockSpec((1, tq, Dh), lambda h, qi, ki: (h, qi, 0)),
            pl.BlockSpec((1, tkv, Dh), lambda h, qi, ki: (h, ki, 0)),
            pl.BlockSpec((1, tkv, Dh), lambda h, qi, ki: (h, ki, 0)),
        ],
        out_specs=pl.BlockSpec((1, tq, Dh), lambda h, qi, ki: (h, qi, 0)),
        out_shape=jax.ShapeDtypeStruct((BH, Sq_p, Dh), jnp.bfloat16),
        scratch_shapes=[
            pltpu.VMEM((tq, 1), jnp.float32),    # running max
            pltpu.VMEM((tq, 1), jnp.float32),    # running sum
            pltpu.VMEM((tq, Dh), jnp.float32),   # output accumulator
        ],
        compiler_params=pltpu.CompilerParams(
            dimension_semantics=("parallel", "parallel", "arbitrary")),
    )(qp, kp, vp)
    return out[:, :Sq, :]


# --------------------------------------------------------------------------
# Transformer building blocks
# --------------------------------------------------------------------------
def _split_heads(x, B, S, H, Dh):
    return x.reshape(B, S, H, Dh).transpose(0, 2, 1, 3).reshape(B * H, S, Dh)


def _merge_heads(x, B, S, H, Dh):
    return x.reshape(B, H, S, Dh).transpose(0, 2, 1, 3).reshape(B * S, H * Dh)


def self_attention_block(x, p, nhead, causal, gamma, beta):
    """Fused QKV projection -> flash attention -> fused (out-proj + residual + LN)."""
    B, S, D = x.shape
    Dh = D // nhead
    x2 = x.reshape(B * S, D)
    qkv = linear(x2, p["wqkv"], p["bqkv"])                       # one MXU pass for Q|K|V
    q, k, v = jnp.split(qkv, 3, axis=-1)
    o = flash_attention(_split_heads(q, B, S, nhead, Dh),
                        _split_heads(k, B, S, nhead, Dh),
                        _split_heads(v, B, S, nhead, Dh),
                        causal=causal)
    o = _merge_heads(o, B, S, nhead, Dh)
    y = linear_residual_layernorm(o, p["wo"], p["bo"], x2, gamma, beta)
    return y.reshape(B, S, D)


def cross_attention_block(y, memory, p, nhead, gamma, beta):
    B, Sq, D = y.shape
    Sk = memory.shape[1]
    Dh = D // nhead
    y2 = y.reshape(B * Sq, D)
    m2 = memory.reshape(B * Sk, D)
    q = linear(y2, p["wq"], p["bq"])
    kv = linear(m2, p["wkv"], p["bkv"])                          # fused K|V projection
    k, v = jnp.split(kv, 2, axis=-1)
    o = flash_attention(_split_heads(q, B, Sq, nhead, Dh),
                        _split_heads(k, B, Sk, nhead, Dh),
                        _split_heads(v, B, Sk, nhead, Dh),
                        causal=False)
    o = _merge_heads(o, B, Sq, nhead, Dh)
    out = linear_residual_layernorm(o, p["wo"], p["bo"], y2, gamma, beta)
    return out.reshape(B, Sq, D)


def ffn_block(x, p, gamma, beta):
    B, S, D = x.shape
    x2 = x.reshape(B * S, D)
    h = linear(x2, *p["lin1"], activation="relu")
    out = linear_residual_layernorm(h, p["lin2"][0], p["lin2"][1], x2, gamma, beta)
    return out.reshape(B, S, D)


def encoder_layer(x, p, nhead):
    x = self_attention_block(x, p["self_attn"], nhead, False, *p["norm1"])
    x = ffn_block(x, p, *p["norm2"])
    return x


def decoder_layer(y, memory, p, nhead, causal):
    y = self_attention_block(y, p["self_attn"], nhead, causal, *p["norm1"])
    y = cross_attention_block(y, memory, p["cross_attn"], nhead, *p["norm2"])
    y = ffn_block(y, p, *p["norm3"])
    return y


def positional_encoding(d_model, max_len=512):
    position = jnp.arange(max_len, dtype=jnp.float32)[:, None]
    div = jnp.exp(jnp.arange(0, d_model, 2, dtype=jnp.float32) * (-math.log(10000.0) / d_model))
    pe = jnp.zeros((max_len, d_model), jnp.float32)
    pe = pe.at[:, 0::2].set(jnp.sin(position * div))
    pe = pe.at[:, 1::2].set(jnp.cos(position * div))
    return pe


def transformer_comment_gen(params, src_ids, tgt_ids, *, nhead, causal_tgt_mask=True):
    # TODO(synk): arbitrary additive tgt_mask tensors are not supported; the standard
    # causal mask (generate_square_subsequent_mask) is generated inside the kernel.
    d_model = params["enc_embed"].shape[1]
    pe = positional_encoding(d_model)
    src = (jnp.take(params["enc_embed"], src_ids, axis=0)
           + pe[None, : src_ids.shape[1]]).astype(jnp.bfloat16)
    tgt = (jnp.take(params["dec_embed"], tgt_ids, axis=0)
           + pe[None, : tgt_ids.shape[1]]).astype(jnp.bfloat16)
    # TODO(synk): nn.Transformer's dropout (p=0.1) is stochastic in train mode; treated as identity (eval).

    x = src
    for p in params["enc_layers"]:
        x = encoder_layer(x, p, nhead)
    B, Ss, D = x.shape
    memory = layernorm(x.reshape(B * Ss, D), *params["enc_norm"]).reshape(B, Ss, D)

    y = tgt
    for p in params["dec_layers"]:
        y = decoder_layer(y, memory, p, nhead, causal_tgt_mask)
    Bt, St, _ = y.shape
    y2 = layernorm(y.reshape(Bt * St, D), *params["dec_norm"])
    logits = linear(y2, params["out_w"], params["out_b"],
                    out_dtype=jnp.float32).reshape(Bt, St, -1)
    return logits


# --------------------------------------------------------------------------
# Deterministic parameter construction (synthetic, matching module shapes).
# Weights pre-cast to bf16, attention scale pre-folded into Q projection.
# --------------------------------------------------------------------------
def _dense_params(key, d_in, d_out, scale=0.05, cast=True):
    kw, kb = jax.random.split(key)
    w = jax.random.normal(kw, (d_in, d_out), jnp.float32) * scale
    b = jax.random.normal(kb, (d_out,), jnp.float32) * scale
    if cast:
        w = w.astype(jnp.bfloat16)
    return w, b


def _self_attn_params(key, d_model, nhead):
    ks = jax.random.split(key, 2)
    wqkv, bqkv = _dense_params(ks[0], d_model, 3 * d_model, cast=False)
    q_scale = 1.0 / math.sqrt(d_model // nhead)
    wqkv = wqkv.at[:, :d_model].multiply(q_scale)        # fold 1/sqrt(Dh) into Q proj
    bqkv = bqkv.at[:d_model].multiply(q_scale)
    wo, bo = _dense_params(ks[1], d_model, d_model)
    return dict(wqkv=wqkv.astype(jnp.bfloat16), bqkv=bqkv, wo=wo, bo=bo)


def _cross_attn_params(key, d_model, nhead):
    ks = jax.random.split(key, 3)
    wq, bq = _dense_params(ks[0], d_model, d_model, cast=False)
    q_scale = 1.0 / math.sqrt(d_model // nhead)
    wq = wq * q_scale
    bq = bq * q_scale
    wkv, bkv = _dense_params(ks[1], d_model, 2 * d_model)
    wo, bo = _dense_params(ks[2], d_model, d_model)
    return dict(wq=wq.astype(jnp.bfloat16), bq=bq, wkv=wkv, bkv=bkv, wo=wo, bo=bo)


def _ln_params(d_model):
    return jnp.ones((d_model,), jnp.float32), jnp.zeros((d_model,), jnp.float32)


def init_params(key, vocab_size, d_model, nhead, num_layers, dim_ff):
    keys = jax.random.split(key, 5)
    params = {
        "enc_embed": jax.random.normal(keys[0], (vocab_size, d_model), jnp.float32) * 0.1,
        "dec_embed": jax.random.normal(keys[1], (vocab_size, d_model), jnp.float32) * 0.1,
    }
    enc_layers = []
    for lk in jax.random.split(keys[2], num_layers):
        sk = jax.random.split(lk, 3)
        enc_layers.append(dict(
            self_attn=_self_attn_params(sk[0], d_model, nhead),
            lin1=_dense_params(sk[1], d_model, dim_ff),
            lin2=_dense_params(sk[2], dim_ff, d_model),
            norm1=_ln_params(d_model),
            norm2=_ln_params(d_model),
        ))
    params["enc_layers"] = enc_layers

    dec_layers = []
    for lk in jax.random.split(keys[3], num_layers):
        sk = jax.random.split(lk, 4)
        dec_layers.append(dict(
            self_attn=_self_attn_params(sk[0], d_model, nhead),
            cross_attn=_cross_attn_params(sk[1], d_model, nhead),
            lin1=_dense_params(sk[2], d_model, dim_ff),
            lin2=_dense_params(sk[3], dim_ff, d_model),
            norm1=_ln_params(d_model),
            norm2=_ln_params(d_model),
            norm3=_ln_params(d_model),
        ))
    params["dec_layers"] = dec_layers

    params["enc_norm"] = _ln_params(d_model)
    params["dec_norm"] = _ln_params(d_model)
    params["out_w"], params["out_b"] = _dense_params(keys[4], d_model, vocab_size)
    return params


# --------------------------------------------------------------------------
if __name__ == "__main__":
    # Small but structurally faithful hyperparameters.
    # (PyTorch defaults are d_model=256, nhead=8, num_layers=4, dim_feedforward=2048.)
    vocab_size, d_model, nhead, num_layers, dim_ff = 128, 128, 4, 2, 256
    B, S_src, S_tgt = 2, 8, 8

    key = jax.random.PRNGKey(0)
    kp, ks, kt = jax.random.split(key, 3)
    params = init_params(kp, vocab_size, d_model, nhead, num_layers, dim_ff)

    src_ids = jax.random.randint(ks, (B, S_src), 0, vocab_size)
    tgt_ids = jax.random.randint(kt, (B, S_tgt), 0, vocab_size)

    # Causal decoder mask (nn.Transformer.generate_square_subsequent_mask) is
    # generated inside the attention kernel (causal_tgt_mask=True).
    fwd = jax.jit(partial(transformer_comment_gen, nhead=nhead, causal_tgt_mask=True))
    logits = fwd(params, src_ids, tgt_ids)
    jax.block_until_ready(logits)

    assert logits.shape == (B, S_tgt, vocab_size), logits.shape
    assert bool(jnp.all(jnp.isfinite(logits)))
    print("KERNEL_OK")
</pallas_src>

<mosaic_0001>
module attributes {stable_mosaic.version = 11 : i64} {
  func.func @_linear_kernel(%arg0: i32, %arg1: i32, %arg2: i32, %arg3: memref<16x128xbf16, #tpu.memory_space<vmem>>, %arg4: memref<128x384xbf16, #tpu.memory_space<vmem>>, %arg5: memref<1x384xf32, #tpu.memory_space<vmem>>, %arg6: memref<16x384xbf16, #tpu.memory_space<vmem>>, %arg7: memref<16x384xf32, #tpu.memory_space<vmem>>) attributes {dimension_semantics = [#tpu.dimension_semantics<parallel>, #tpu.dimension_semantics<parallel>, #tpu.dimension_semantics<arbitrary>], iteration_bounds = array<i64: 1, 1, 1>, scalar_prefetch = 0 : i64, scratch_operands = 1 : i64, tpu.core_type = #tpu.core_type<tc>, window_params = [{transform_indices = @transform_0, window_bounds = array<i64: 16, 128>}, {transform_indices = @transform_1, window_bounds = array<i64: 128, 384>}, {transform_indices = @transform_2, window_bounds = array<i64: 1, 384>}, {transform_indices = @transform_3, window_bounds = array<i64: 16, 384>}]} {
    %c0_i32 = arith.constant 0 : i32
    %0 = arith.cmpi eq, %arg2, %c0_i32 : i32
    %1 = arith.extui %0 : i1 to i32
    %c0_i32_0 = arith.constant 0 : i32
    %2 = arith.cmpi ne, %1, %c0_i32_0 : i32
    scf.if %2 {
      %cst_10 = arith.constant 0.000000e+00 : f32
      %12 = vector.broadcast %cst_10 : f32 to vector<16x384xf32>
      %c0_11 = arith.constant 0 : index
      %c0_12 = arith.constant 0 : index
      %13 = vector.load %arg7[%c0_11, %c0_12] : memref<16x384xf32, #tpu.memory_space<vmem>>, vector<16x384xf32>
      tpu.vector_store %arg7[%c0_11, %c0_12], %12 {strides = array<i32>} : memref<16x384xf32, #tpu.memory_space<vmem>>, vector<16x384xf32>,
    } else {
    }
    %c0 = arith.constant 0 : index
    %c0_1 = arith.constant 0 : index
    %3 = vector.load %arg7[%c0, %c0_1] : memref<16x384xf32, #tpu.memory_space<vmem>>, vector<16x384xf32>
    %c0_2 = arith.constant 0 : index
    %c0_3 = arith.constant 0 : index
    %4 = vector.load %arg3[%c0_2, %c0_3] : memref<16x128xbf16, #tpu.memory_space<vmem>>, vector<16x128xbf16>
    %c0_4 = arith.constant 0 : index
    %c0_5 = arith.constant 0 : index
    %5 = vector.load %arg4[%c0_4, %c0_5] : memref<128x384xbf16, #tpu.memory_space<vmem>>, vector<128x384xbf16>
    %cst = arith.constant dense<0.000000e+00> : vector<16x384xf32>
    %6 = tpu.matmul %4, %5, %cst {dimension_numbers = #tpu.dot_dimension_numbers<[1], [0], [0], [1], [0, 0, 1, 1], [], []>} : vector<16x128xbf16>, vector<128x384xbf16>, vector<16x384xf32> -> vector<16x384xf32>
    %7 = arith.addf %3, %6 : vector<16x384xf32>
    %c0_6 = arith.constant 0 : index
    %c0_7 = arith.constant 0 : index
    %8 = vector.load %arg7[%c0_6, %c0_7] : memref<16x384xf32, #tpu.memory_space<vmem>>, vector<16x384xf32>
    tpu.vector_store %arg7[%c0_6, %c0_7], %7 {strides = array<i32>} : memref<16x384xf32, #tpu.memory_space<vmem>>, vector<16x384xf32>,
    %c0_i32_8 = arith.constant 0 : i32
    %9 = arith.cmpi eq, %arg2, %c0_i32_8 : i32
    %10 = arith.extui %9 : i1 to i32
    %c0_i32_9 = arith.constant 0 : i32
    %11 = arith.cmpi ne, %10, %c0_i32_9 : i32
    scf.if %11 {
      %c0_10 = arith.constant 0 : index
      %c0_11 = arith.constant 0 : index
      %12 = vector.load %arg7[%c0_10, %c0_11] : memref<16x384xf32, #tpu.memory_space<vmem>>, vector<16x384xf32>
      %c0_12 = arith.constant 0 : index
      %c0_13 = arith.constant 0 : index
      %13 = vector.load %arg5[%c0_12, %c0_13] : memref<1x384xf32, #tpu.memory_space<vmem>>, vector<1x384xf32>
      %14 = vector.broadcast %13 : vector<1x384xf32> to vector<16x384xf32>
      %15 = arith.addf %12, %14 : vector<16x384xf32>
      %16 = arith.truncf %15 : vector<16x384xf32> to vector<16x384xbf16>
      %c0_14 = arith.constant 0 : index
      %c0_15 = arith.constant 0 : index
      %17 = vector.load %arg6[%c0_14, %c0_15] : memref<16x384xbf16, #tpu.memory_space<vmem>>, vector<16x384xbf16>
      tpu.vector_store %arg6[%c0_14, %c0_15], %16 {strides = array<i32>} : memref<16x384xbf16, #tpu.memory_space<vmem>>, vector<16x384xbf16>,
    } else {
    }
    return
  }
  func.func @transform_0(%arg0: i32, %arg1: i32, %arg2: i32) -> (i32, i32) {
    %c0_i32 = arith.constant 0 : i32
    return %arg0, %arg2 : i32, i32
  }
  func.func @transform_1(%arg0: i32, %arg1: i32, %arg2: i32) -> (i32, i32) {
    %c0_i32 = arith.constant 0 : i32
    return %arg2, %arg1 : i32, i32
  }
  func.func @transform_2(%arg0: i32, %arg1: i32, %arg2: i32) -> (i32, i32) {
    %c0_i32 = arith.constant 0 : i32
    %c0_i32_0 = arith.constant 0 : i32
    return %c0_i32, %arg1 : i32, i32
  }
  func.func @transform_3(%arg0: i32, %arg1: i32, %arg2: i32) -> (i32, i32) {
    %c0_i32 = arith.constant 0 : i32
    return %arg0, %arg1 : i32, i32
  }
}

module attributes {stable_mosaic.version = 11 : i64} {
  func.func @_flash_attn_kernel(%arg0: i32, %arg1: i32, %arg2: i32, %arg3: memref<1x16x32xbf16, #tpu.memory_space<vmem>>, %arg4: memref<1x16x32xbf16, #tpu.memory_space<vmem>>, %arg5: memref<1x16x32xbf16, #tpu.memory_space<vmem>>, %arg6: memref<1x16x32xbf16, #tpu.memory_space<vmem>>, %arg7: memref<16x1xf32, #tpu.memory_space<vmem>>, %arg8: memref<16x1xf32, #tpu.memory_space<vmem>>, %arg9: memref<16x32xf32, #tpu.memory_space<vmem>>) attributes {dimension_semantics = [#tpu.dimension_semantics<parallel>, #tpu.dimension_semantics<parallel>, #tpu.dimension_semantics<arbitrary>], iteration_bounds = array<i64: 8, 1, 1>, scalar_prefetch = 0 : i64, scratch_operands = 3 : i64, tpu.core_type = #tpu.core_type<tc>, window_params = [{transform_indices = @transform_0, window_bounds = array<i64: 1, 16, 32>}, {transform_indices = @transform_1, window_bounds = array<i64: 1, 16, 32>}, {transform_indices = @transform_2, window_bounds = array<i64: 1, 16, 32>}, {transform_indices = @transform_3, window_bounds = array<i64: 1, 16, 32>}]} {
    %c0_i32 = arith.constant 0 : i32
    %0 = arith.cmpi eq, %arg2, %c0_i32 : i32
    %1 = arith.extui %0 : i1 to i32
    %c0_i32_0 = arith.constant 0 : i32
    %2 = arith.cmpi ne, %1, %c0_i32_0 : i32
    scf.if %2 {
      %cst_27 = arith.constant -1.000000e+30 : f32
      %44 = vector.broadcast %cst_27 : f32 to vector<16x1xf32>
      %c0_28 = arith.constant 0 : index
      %c0_29 = arith.constant 0 : index
      %45 = vector.load %arg7[%c0_28, %c0_29] : memref<16x1xf32, #tpu.memory_space<vmem>>, vector<16x1xf32>
      tpu.vector_store %arg7[%c0_28, %c0_29], %44 {strides = array<i32>} : memref<16x1xf32, #tpu.memory_space<vmem>>, vector<16x1xf32>,
      %cst_30 = arith.constant 0.000000e+00 : f32
      %46 = vector.broadcast %cst_30 : f32 to vector<16x1xf32>
      %c0_31 = arith.constant 0 : index
      %c0_32 = arith.constant 0 : index
      %47 = vector.load %arg8[%c0_31, %c0_32] : memref<16x1xf32, #tpu.memory_space<vmem>>, vector<16x1xf32>
      tpu.vector_store %arg8[%c0_31, %c0_32], %46 {strides = array<i32>} : memref<16x1xf32, #tpu.memory_space<vmem>>, vector<16x1xf32>,
      %cst_33 = arith.constant 0.000000e+00 : f32
      %48 = vector.broadcast %cst_33 : f32 to vector<16x32xf32>
      %c0_34 = arith.constant 0 : index
      %c0_35 = arith.constant 0 : index
      %49 = vector.load %arg9[%c0_34, %c0_35] : memref<16x32xf32, #tpu.memory_space<vmem>>, vector<16x32xf32>
      tpu.vector_store %arg9[%c0_34, %c0_35], %48 {strides = array<i32>} : memref<16x32xf32, #tpu.memory_space<vmem>>, vector<16x32xf32>,
    } else {
    }
    %c0 = arith.constant 0 : index
    %c0_1 = arith.constant 0 : index
    %c0_2 = arith.constant 0 : index
    %3 = vector.load %arg3[%c0, %c0_1, %c0_2] : memref<1x16x32xbf16, #tpu.memory_space<vmem>>, vector<1x16x32xbf16>
    %4 = vector.shape_cast %3 : vector<1x16x32xbf16> to vector<16x32xbf16>
    %c0_3 = arith.constant 0 : index
    %c0_4 = arith.constant 0 : index
    %c0_5 = arith.constant 0 : index
    %5 = vector.load %arg4[%c0_3, %c0_4, %c0_5] : memref<1x16x32xbf16, #tpu.memory_space<vmem>>, vector<1x16x32xbf16>
    %6 = vector.shape_cast %5 : vector<1x16x32xbf16> to vector<16x32xbf16>
    %cst = arith.constant dense<0.000000e+00> : vector<16x16xf32>
    %7 = tpu.matmul %4, %6, %cst {dimension_numbers = #tpu.dot_dimension_numbers<[1], [1], [0], [0], [0, 0, 1, 0], [], []>} : vector<16x32xbf16>, vector<16x32xbf16>, vector<16x16xf32> -> vector<16x16xf32>
    %c16_i32 = arith.constant 16 : i32
    %8 = arith.muli %arg2, %c16_i32 : i32
    %9 = tpu.iota {dimensions = array<i32: 1>} : vector<16x16xi32>
    %10 = vector.broadcast %8 : i32 to vector<16x16xi32>
    %11 = arith.addi %10, %9 : vector<16x16xi32>
    %c8_i32 = arith.constant 8 : i32
    %12 = vector.broadcast %c8_i32 : i32 to vector<16x16xi32>
    %13 = arith.cmpi sge, %11, %12 : vector<16x16xi32>
    %cst_6 = arith.constant -1.000000e+30 : f32
    %14 = vector.broadcast %cst_6 : f32 to vector<16x16xf32>
    %15 = arith.select %13, %14, %7 : vector<16x16xi1>, vector<16x16xf32>
    %c0_7 = arith.constant 0 : index
    %c0_8 = arith.constant 0 : index
    %16 = vector.load %arg7[%c0_7, %c0_8] : memref<16x1xf32, #tpu.memory_space<vmem>>, vector<16x1xf32>
    %cst_9 = arith.constant dense<0xFF800000> : vector<16xf32>
    %17 = vector.multi_reduction <maximumf>, %15, %cst_9 [1] : vector<16x16xf32> to vector<16xf32>
    %18 = vector.shape_cast %17 : vector<16xf32> to vector<16x1xf32>
    %19 = arith.maximumf %16, %18 : vector<16x1xf32>
    %20 = arith.subf %16, %19 : vector<16x1xf32>
    %21 = math.exp %20 : vector<16x1xf32>
    %22 = vector.broadcast %19 : vector<16x1xf32> to vector<16x16xf32>
    %23 = arith.subf %15, %22 : vector<16x16xf32>
    %24 = math.exp %23 : vector<16x16xf32>
    %c0_10 = arith.constant 0 : index
    %c0_11 = arith.constant 0 : index
    %25 = vector.load %arg8[%c0_10, %c0_11] : memref<16x1xf32, #tpu.memory_space<vmem>>, vector<16x1xf32>
    %26 = arith.mulf %21, %25 : vector<16x1xf32>
    %cst_12 = arith.constant dense<0.000000e+00> : vector<16xf32>
    %27 = vector.multi_reduction <add>, %24, %cst_12 [1] : vector<16x16xf32> to vector<16xf32>
    %28 = vector.shape_cast %27 : vector<16xf32> to vector<16x1xf32>
    %29 = arith.addf %26, %28 : vector<16x1xf32>
    %c0_13 = arith.constant 0 : index
    %c0_14 = arith.constant 0 : index
    %30 = vector.load %arg8[%c0_13, %c0_14] : memref<16x1xf32, #tpu.memory_space<vmem>>, vector<16x1xf32>
    tpu.vector_store %arg8[%c0_13, %c0_14], %29 {strides = array<i32>} : memref<16x1xf32, #tpu.memory_space<vmem>>, vector<16x1xf32>,
    %c0_15 = arith.constant 0 : index
    %c0_16 = arith.constant 0 : index
    %31 = vector.load %arg9[%c0_15, %c0_16] : memref<16x32xf32, #tpu.memory_space<vmem>>, vector<16x32xf32>
    %32 = vector.broadcast %21 : vector<16x1xf32> to vector<16x32xf32>
    %33 = arith.mulf %32, %31 : vector<16x32xf32>
    %34 = arith.truncf %24 : vector<16x16xf32> to vector<16x16xbf16>
    %c0_17 = arith.constant 0 : index
    %c0_18 = arith.constant 0 : index
    %c0_19 = arith.constant 0 : index
    %35 = vector.load %arg5[%c0_17, %c0_18, %c0_19] : memref<1x16x32xbf16, #tpu.memory_space<vmem>>, vector<1x16x32xbf16>
    %36 = vector.shape_cast %35 : vector<1x16x32xbf16> to vector<16x32xbf16>
    %cst_20 = arith.constant dense<0.000000e+00> : vector<16x32xf32>
    %37 = tpu.matmul %34, %36, %cst_20 {dimension_numbers = #tpu.dot_dimension_numbers<[1], [0], [0], [1], [0, 0, 1, 1], [], []>} : vector<16x16xbf16>, vector<16x32xbf16>, vector<16x32xf32> -> vector<16x32xf32>
    %38 = arith.addf %33, %37 : vector<16x32xf32>
    %c0_21 = arith.constant 0 : index
    %c0_22 = arith.constant 0 : index
    %39 = vector.load %arg9[%c0_21, %c0_22] : memref<16x32xf32, #tpu.memory_space<vmem>>, vector<16x32xf32>
    tpu.vector_store %arg9[%c0_21, %c0_22], %38 {strides = array<i32>} : memref<16x32xf32, #tpu.memory_space<vmem>>, vector<16x32xf32>,
    %c0_23 = arith.constant 0 : index
    %c0_24 = arith.constant 0 : index
    %40 = vector.load %arg7[%c0_23, %c0_24] : memref<16x1xf32, #tpu.memory_space<vmem>>, vector<16x1xf32>
    tpu.vector_store %arg7[%c0_23, %c0_24], %19 {strides = array<i32>} : memref<16x1xf32, #tpu.memory_space<vmem>>, vector<16x1xf32>,
    %c0_i32_25 = arith.constant 0 : i32
    %41 = arith.cmpi eq, %arg2, %c0_i32_25 : i32
    %42 = arith.extui %41 : i1 to i32
    %c0_i32_26 = arith.constant 0 : i32
    %43 = arith.cmpi ne, %42, %c0_i32_26 : i32
    scf.if %43 {
      %c0_27 = arith.constant 0 : index
      %c0_28 = arith.constant 0 : index
      %44 = vector.load %arg8[%c0_27, %c0_28] : memref<16x1xf32, #tpu.memory_space<vmem>>, vector<16x1xf32>
      %45 = tpu.reciprocal %44 {approx = true} : vector<16x1xf32> -> vector<16x1xf32>
      %c0_29 = arith.constant 0 : index
      %c0_30 = arith.constant 0 : index
      %46 = vector.load %arg9[%c0_29, %c0_30] : memref<16x32xf32, #tpu.memory_space<vmem>>, vector<16x32xf32>
      %47 = vector.broadcast %45 : vector<16x1xf32> to vector<16x32xf32>
      %48 = arith.mulf %46, %47 : vector<16x32xf32>
      %49 = arith.truncf %48 : vector<16x32xf32> to vector<16x32xbf16>
      %c0_31 = arith.constant 0 : index
      %c0_32 = arith.constant 0 : index
      %c0_33 = arith.constant 0 : index
      %50 = vector.load %arg6[%c0_31, %c0_32, %c0_33] : memref<1x16x32xbf16, #tpu.memory_space<vmem>>, vector<1x16x32xbf16>
      %51 = vector.shape_cast %50 : vector<1x16x32xbf16> to vector<16x32xbf16>
      %52 = vector.shape_cast %49 : vector<16x32xbf16> to vector<1x16x32xbf16>
      tpu.vector_store %arg6[%c0_31, %c0_32, %c0_33], %52 {strides = array<i32>} : memref<1x16x32xbf16, #tpu.memory_space<vmem>>, vector<1x16x32xbf16>,
    } else {
    }
    return
  }
  func.func @transform_0(%arg0: i32, %arg1: i32, %arg2: i32) -> (i32, i32, i32) {
    %c0_i32 = arith.constant 0 : i32
    %c0_i32_0 = arith.constant 0 : i32
    return %arg0, %arg1, %c0_i32 : i32, i32, i32
  }
  func.func @transform_1(%arg0: i32, %arg1: i32, %arg2: i32) -> (i32, i32, i32) {
    %c0_i32 = arith.constant 0 : i32
    %c0_i32_0 = arith.constant 0 : i32
    return %arg0, %arg2, %c0_i32 : i32, i32, i32
  }
  func.func @transform_2(%arg0: i32, %arg1: i32, %arg2: i32) -> (i32, i32, i32) {
    %c0_i32 = arith.constant 0 : i32
    %c0_i32_0 = arith.constant 0 : i32
    return %arg0, %arg2, %c0_i32 : i32, i32, i32
  }
  func.func @transform_3(%arg0: i32, %arg1: i32, %arg2: i32) -> (i32, i32, i32) {
    %c0_i32 = arith.constant 0 : i32
    %c0_i32_0 = arith.constant 0 : i32
    return %arg0, %arg1, %c0_i32 : i32, i32, i32
  }
}

module attributes {stable_mosaic.version = 11 : i64} {
  func.func @_lin_res_ln_kernel(%arg0: i32, %arg1: i32, %arg2: memref<16x128xbf16, #tpu.memory_space<vmem>>, %arg3: memref<128x128xbf16, #tpu.memory_space<vmem>>, %arg4: memref<1x128xf32, #tpu.memory_space<vmem>>, %arg5: memref<16x128xbf16, #tpu.memory_space<vmem>>, %arg6: memref<1x128xf32, #tpu.memory_space<vmem>>, %arg7: memref<1x128xf32, #tpu.memory_space<vmem>>, %arg8: memref<16x128xbf16, #tpu.memory_space<vmem>>, %arg9: memref<16x128xf32, #tpu.memory_space<vmem>>) attributes {dimension_semantics = [#tpu.dimension_semantics<parallel>, #tpu.dimension_semantics<arbitrary>], iteration_bounds = array<i64: 1, 1>, scalar_prefetch = 0 : i64, scratch_operands = 1 : i64, tpu.core_type = #tpu.core_type<tc>, window_params = [{transform_indices = @transform_0, window_bounds = array<i64: 16, 128>}, {transform_indices = @transform_1, window_bounds = array<i64: 128, 128>}, {pipeline_mode = #tpu.pipeline_mode<synchronous>, transform_indices = @transform_2, window_bounds = array<i64: 1, 128>}, {transform_indices = @transform_3, window_bounds = array<i64: 16, 128>}, {pipeline_mode = #tpu.pipeline_mode<synchronous>, transform_indices = @transform_4, window_bounds = array<i64: 1, 128>}, {pipeline_mode = #tpu.pipeline_mode<synchronous>, transform_indices = @transform_5, window_bounds = array<i64: 1, 128>}, {transform_indices = @transform_6, window_bounds = array<i64: 16, 128>}]} {
    %c0_i32 = arith.constant 0 : i32
    %0 = arith.cmpi eq, %arg1, %c0_i32 : i32
    %1 = arith.extui %0 : i1 to i32
    %c0_i32_0 = arith.constant 0 : i32
    %2 = arith.cmpi ne, %1, %c0_i32_0 : i32
    scf.if %2 {
      %cst_10 = arith.constant 0.000000e+00 : f32
      %12 = vector.broadcast %cst_10 : f32 to vector<16x128xf32>
      %c0_11 = arith.constant 0 : index
      %c0_12 = arith.constant 0 : index
      %13 = vector.load %arg9[%c0_11, %c0_12] : memref<16x128xf32, #tpu.memory_space<vmem>>, vector<16x128xf32>
      tpu.vector_store %arg9[%c0_11, %c0_12], %12 {strides = array<i32>} : memref<16x128xf32, #tpu.memory_space<vmem>>, vector<16x128xf32>,
    } else {
    }
    %c0 = arith.constant 0 : index
    %c0_1 = arith.constant 0 : index
    %3 = vector.load %arg9[%c0, %c0_1] : memref<16x128xf32, #tpu.memory_space<vmem>>, vector<16x128xf32>
    %c0_2 = arith.constant 0 : index
    %c0_3 = arith.constant 0 : index
    %4 = vector.load %arg2[%c0_2, %c0_3] : memref<16x128xbf16, #tpu.memory_space<vmem>>, vector<16x128xbf16>
    %c0_4 = arith.constant 0 : index
    %c0_5 = arith.constant 0 : index
    %5 = vector.load %arg3[%c0_4, %c0_5] : memref<128x128xbf16, #tpu.memory_space<vmem>>, vector<128x128xbf16>
    %cst = arith.constant dense<0.000000e+00> : vector<16x128xf32>
    %6 = tpu.matmul %4, %5, %cst {dimension_numbers = #tpu.dot_dimension_numbers<[1], [0], [0], [1], [0, 0, 1, 1], [], []>} : vector<16x128xbf16>, vector<128x128xbf16>, vector<16x128xf32> -> vector<16x128xf32>
    %7 = arith.addf %3, %6 : vector<16x128xf32>
    %c0_6 = arith.constant 0 : index
    %c0_7 = arith.constant 0 : index
    %8 = vector.load %arg9[%c0_6, %c0_7] : memref<16x128xf32, #tpu.memory_space<vmem>>, vector<16x128xf32>
    tpu.vector_store %arg9[%c0_6, %c0_7], %7 {strides = array<i32>} : memref<16x128xf32, #tpu.memory_space<vmem>>, vector<16x128xf32>,
    %c0_i32_8 = arith.constant 0 : i32
    %9 = arith.cmpi eq, %arg1, %c0_i32_8 : i32
    %10 = arith.extui %9 : i1 to i32
    %c0_i32_9 = arith.constant 0 : i32
    %11 = arith.cmpi ne, %10, %c0_i32_9 : i32
    scf.if %11 {
      %c0_10 = arith.constant 0 : index
      %c0_11 = arith.constant 0 : index
      %12 = vector.load %arg9[%c0_10, %c0_11] : memref<16x128xf32, #tpu.memory_space<vmem>>, vector<16x128xf32>
      %c0_12 = arith.constant 0 : index
      %c0_13 = arith.constant 0 : index
      %13 = vector.load %arg4[%c0_12, %c0_13] : memref<1x128xf32, #tpu.memory_space<vmem>>, vector<1x128xf32>
      %14 = vector.broadcast %13 : vector<1x128xf32> to vector<16x128xf32>
      %15 = arith.addf %12, %14 : vector<16x128xf32>
      %c0_14 = arith.constant 0 : index
      %c0_15 = arith.constant 0 : index
      %16 = vector.load %arg5[%c0_14, %c0_15] : memref<16x128xbf16, #tpu.memory_space<vmem>>, vector<16x128xbf16>
      %17 = arith.extf %16 : vector<16x128xbf16> to vector<16x128xf32>
      %18 = arith.addf %15, %17 : vector<16x128xf32>
      %cst_16 = arith.constant dense<0.000000e+00> : vector<16xf32>
      %19 = vector.multi_reduction <add>, %18, %cst_16 [1] : vector<16x128xf32> to vector<16xf32>
      %20 = vector.shape_cast %19 : vector<16xf32> to vector<16x1xf32>
      %cst_17 = arith.constant 1.280000e+02 : f32
      %21 = vector.broadcast %cst_17 : f32 to vector<16x1xf32>
      %22 = arith.divf %20, %21 : vector<16x1xf32>
      %23 = vector.broadcast %22 : vector<16x1xf32> to vector<16x128xf32>
      %24 = arith.subf %18, %23 : vector<16x128xf32>
      %25 = arith.mulf %24, %24 : vector<16x128xf32>
      %cst_18 = arith.constant dense<0.000000e+00> : vector<16xf32>
      %26 = vector.multi_reduction <add>, %25, %cst_18 [1] : vector<16x128xf32> to vector<16xf32>
      %27 = vector.shape_cast %26 : vector<16xf32> to vector<16x1xf32>
      %cst_19 = arith.constant 1.280000e+02 : f32
      %28 = vector.broadcast %cst_19 : f32 to vector<16x1xf32>
      %29 = arith.divf %27, %28 : vector<16x1xf32>
      %30 = vector.broadcast %22 : vector<16x1xf32> to vector<16x128xf32>
      %31 = arith.subf %18, %30 : vector<16x128xf32>
      %cst_20 = arith.constant 9.99999974E-6 : f32
      %32 = vector.broadcast %cst_20 : f32 to vector<16x1xf32>
      %33 = arith.addf %29, %32 : vector<16x1xf32>
      %34 = math.rsqrt %33 : vector<16x1xf32>
      %35 = vector.broadcast %34 : vector<16x1xf32> to vector<16x128xf32>
      %36 = arith.mulf %31, %35 : vector<16x128xf32>
      %c0_21 = arith.constant 0 : index
      %c0_22 = arith.constant 0 : index
      %37 = vector.load %arg6[%c0_21, %c0_22] : memref<1x128xf32, #tpu.memory_space<vmem>>, vector<1x128xf32>
      %38 = vector.broadcast %37 : vector<1x128xf32> to vector<16x128xf32>
      %39 = arith.mulf %36, %38 : vector<16x128xf32>
      %c0_23 = arith.constant 0 : index
      %c0_24 = arith.constant 0 : index
      %40 = vector.load %arg7[%c0_23, %c0_24] : memref<1x128xf32, #tpu.memory_space<vmem>>, vector<1x128xf32>
      %41 = vector.broadcast %40 : vector<1x128xf32> to vector<16x128xf32>
      %42 = arith.addf %39, %41 : vector<16x128xf32>
      %43 = arith.truncf %42 : vector<16x128xf32> to vector<16x128xbf16>
      %c0_25 = arith.constant 0 : index
      %c0_26 = arith.constant 0 : index
      %44 = vector.load %arg8[%c0_25, %c0_26] : memref<16x128xbf16, #tpu.memory_space<vmem>>, vector<16x128xbf16>
      tpu.vector_store %arg8[%c0_25, %c0_26], %43 {strides = array<i32>} : memref<16x128xbf16, #tpu.memory_space<vmem>>, vector<16x128xbf16>,
    } else {
    }
    return
  }
  func.func @transform_0(%arg0: i32, %arg1: i32) -> (i32, i32) {
    %c0_i32 = arith.constant 0 : i32
    return %arg0, %arg1 : i32, i32
  }
  func.func @transform_1(%arg0: i32, %arg1: i32) -> (i32, i32) {
    %c0_i32 = arith.constant 0 : i32
    %c0_i32_0 = arith.constant 0 : i32
    return %arg1, %c0_i32 : i32, i32
  }
  func.func @transform_2(%arg0: i32, %arg1: i32) -> (i32, i32) {
    %c0_i32 = arith.constant 0 : i32
    %c0_i32_0 = arith.constant 0 : i32
    %c0_i32_1 = arith.constant 0 : i32
    return %c0_i32, %c0_i32_0 : i32, i32
  }
  func.func @transform_3(%arg0: i32, %arg1: i32) -> (i32, i32) {
    %c0_i32 = arith.constant 0 : i32
    %c0_i32_0 = arith.constant 0 : i32
    return %arg0, %c0_i32 : i32, i32
  }
  func.func @transform_4(%arg0: i32, %arg1: i32) -> (i32, i32) {
    %c0_i32 = arith.constant 0 : i32
    %c0_i32_0 = arith.constant 0 : i32
    %c0_i32_1 = arith.constant 0 : i32
    return %c0_i32, %c0_i32_0 : i32, i32
  }
  func.func @transform_5(%arg0: i32, %arg1: i32) -> (i32, i32) {
    %c0_i32 = arith.constant 0 : i32
    %c0_i32_0 = arith.constant 0 : i32
    %c0_i32_1 = arith.constant 0 : i32
    return %c0_i32, %c0_i32_0 : i32, i32
  }
  func.func @transform_6(%arg0: i32, %arg1: i32) -> (i32, i32) {
    %c0_i32 = arith.constant 0 : i32
    %c0_i32_0 = arith.constant 0 : i32
    return %arg0, %c0_i32 : i32, i32
  }
}

module attributes {stable_mosaic.version = 11 : i64} {
  func.func @_linear_kernel(%arg0: i32, %arg1: i32, %arg2: i32, %arg3: memref<16x128xbf16, #tpu.memory_space<vmem>>, %arg4: memref<128x256xbf16, #tpu.memory_space<vmem>>, %arg5: memref<1x256xf32, #tpu.memory_space<vmem>>, %arg6: memref<16x256xbf16, #tpu.memory_space<vmem>>, %arg7: memref<16x256xf32, #tpu.memory_space<vmem>>) attributes {dimension_semantics = [#tpu.dimension_semantics<parallel>, #tpu.dimension_semantics<parallel>, #tpu.dimension_semantics<arbitrary>], iteration_bounds = array<i64: 1, 1, 1>, scalar_prefetch = 0 : i64, scratch_operands = 1 : i64, tpu.core_type = #tpu.core_type<tc>, window_params = [{transform_indices = @transform_0, window_bounds = array<i64: 16, 128>}, {transform_indices = @transform_1, window_bounds = array<i64: 128, 256>}, {transform_indices = @transform_2, window_bounds = array<i64: 1, 256>}, {transform_indices = @transform_3, window_bounds = array<i64: 16, 256>}]} {
    %c0_i32 = arith.constant 0 : i32
    %0 = arith.cmpi eq, %arg2, %c0_i32 : i32
    %1 = arith.extui %0 : i1 to i32
    %c0_i32_0 = arith.constant 0 : i32
    %2 = arith.cmpi ne, %1, %c0_i32_0 : i32
    scf.if %2 {
      %cst_10 = arith.constant 0.000000e+00 : f32
      %12 = vector.broadcast %cst_10 : f32 to vector<16x256xf32>
      %c0_11 = arith.constant 0 : index
      %c0_12 = arith.constant 0 : index
      %13 = vector.load %arg7[%c0_11, %c0_12] : memref<16x256xf32, #tpu.memory_space<vmem>>, vector<16x256xf32>
      tpu.vector_store %arg7[%c0_11, %c0_12], %12 {strides = array<i32>} : memref<16x256xf32, #tpu.memory_space<vmem>>, vector<16x256xf32>,
    } else {
    }
    %c0 = arith.constant 0 : index
    %c0_1 = arith.constant 0 : index
    %3 = vector.load %arg7[%c0, %c0_1] : memref<16x256xf32, #tpu.memory_space<vmem>>, vector<16x256xf32>
    %c0_2 = arith.constant 0 : index
    %c0_3 = arith.constant 0 : index
    %4 = vector.load %arg3[%c0_2, %c0_3] : memref<16x128xbf16, #tpu.memory_space<vmem>>, vector<16x128xbf16>
    %c0_4 = arith.constant 0 : index
    %c0_5 = arith.constant 0 : index
    %5 = vector.load %arg4[%c0_4, %c0_5] : memref<128x256xbf16, #tpu.memory_space<vmem>>, vector<128x256xbf16>
    %cst = arith.constant dense<0.000000e+00> : vector<16x256xf32>
    %6 = tpu.matmul %4, %5, %cst {dimension_numbers = #tpu.dot_dimension_numbers<[1], [0], [0], [1], [0, 0, 1, 1], [], []>} : vector<16x128xbf16>, vector<128x256xbf16>, vector<16x256xf32> -> vector<16x256xf32>
    %7 = arith.addf %3, %6 : vector<16x256xf32>
    %c0_6 = arith.constant 0 : index
    %c0_7 = arith.constant 0 : index
    %8 = vector.load %arg7[%c0_6, %c0_7] : memref<16x256xf32, #tpu.memory_space<vmem>>, vector<16x256xf32>
    tpu.vector_store %arg7[%c0_6, %c0_7], %7 {strides = array<i32>} : memref<16x256xf32, #tpu.memory_space<vmem>>, vector<16x256xf32>,
    %c0_i32_8 = arith.constant 0 : i32
    %9 = arith.cmpi eq, %arg2, %c0_i32_8 : i32
    %10 = arith.extui %9 : i1 to i32
    %c0_i32_9 = arith.constant 0 : i32
    %11 = arith.cmpi ne, %10, %c0_i32_9 : i32
    scf.if %11 {
      %c0_10 = arith.constant 0 : index
      %c0_11 = arith.constant 0 : index
      %12 = vector.load %arg7[%c0_10, %c0_11] : memref<16x256xf32, #tpu.memory_space<vmem>>, vector<16x256xf32>
      %c0_12 = arith.constant 0 : index
      %c0_13 = arith.constant 0 : index
      %13 = vector.load %arg5[%c0_12, %c0_13] : memref<1x256xf32, #tpu.memory_space<vmem>>, vector<1x256xf32>
      %14 = vector.broadcast %13 : vector<1x256xf32> to vector<16x256xf32>
      %15 = arith.addf %12, %14 : vector<16x256xf32>
      %cst_14 = arith.constant 0.000000e+00 : f32
      %16 = vector.broadcast %cst_14 : f32 to vector<16x256xf32>
      %17 = arith.maximumf %15, %16 : vector<16x256xf32>
      %18 = arith.truncf %17 : vector<16x256xf32> to vector<16x256xbf16>
      %c0_15 = arith.constant 0 : index
      %c0_16 = arith.constant 0 : index
      %19 = vector.load %arg6[%c0_15, %c0_16] : memref<16x256xbf16, #tpu.memory_space<vmem>>, vector<16x256xbf16>
      tpu.vector_store %arg6[%c0_15, %c0_16], %18 {strides = array<i32>} : memref<16x256xbf16, #tpu.memory_space<vmem>>, vector<16x256xbf16>,
    } else {
    }
    return
  }
  func.func @transform_0(%arg0: i32, %arg1: i32, %arg2: i32) -> (i32, i32) {
    %c0_i32 = arith.constant 0 : i32
    return %arg0, %arg2 : i32, i32
  }
  func.func @transform_1(%arg0: i32, %arg1: i32, %arg2: i32) -> (i32, i32) {
    %c0_i32 = arith.constant 0 : i32
    return %arg2, %arg1 : i32, i32
  }
  func.func @transform_2(%arg0: i32, %arg1: i32, %arg2: i32) -> (i32, i32) {
    %c0_i32 = arith.constant 0 : i32
    %c0_i32_0 = arith.constant 0 : i32
    return %c0_i32, %arg1 : i32, i32
  }
  func.func @transform_3(%arg0: i32, %arg1: i32, %arg2: i32) -> (i32, i32) {
    %c0_i32 = arith.constant 0 : i32
    return %arg0, %arg1 : i32, i32
  }
}

module attributes {stable_mosaic.version = 11 : i64} {
  func.func @_lin_res_ln_kernel(%arg0: i32, %arg1: i32, %arg2: memref<16x256xbf16, #tpu.memory_space<vmem>>, %arg3: memref<256x128xbf16, #tpu.memory_space<vmem>>, %arg4: memref<1x128xf32, #tpu.memory_space<vmem>>, %arg5: memref<16x128xbf16, #tpu.memory_space<vmem>>, %arg6: memref<1x128xf32, #tpu.memory_space<vmem>>, %arg7: memref<1x128xf32, #tpu.memory_space<vmem>>, %arg8: memref<16x128xbf16, #tpu.memory_space<vmem>>, %arg9: memref<16x128xf32, #tpu.memory_space<vmem>>) attributes {dimension_semantics = [#tpu.dimension_semantics<parallel>, #tpu.dimension_semantics<arbitrary>], iteration_bounds = array<i64: 1, 1>, scalar_prefetch = 0 : i64, scratch_operands = 1 : i64, tpu.core_type = #tpu.core_type<tc>, window_params = [{transform_indices = @transform_0, window_bounds = array<i64: 16, 256>}, {transform_indices = @transform_1, window_bounds = array<i64: 256, 128>}, {pipeline_mode = #tpu.pipeline_mode<synchronous>, transform_indices = @transform_2, window_bounds = array<i64: 1, 128>}, {transform_indices = @transform_3, window_bounds = array<i64: 16, 128>}, {pipeline_mode = #tpu.pipeline_mode<synchronous>, transform_indices = @transform_4, window_bounds = array<i64: 1, 128>}, {pipeline_mode = #tpu.pipeline_mode<synchronous>, transform_indices = @transform_5, window_bounds = array<i64: 1, 128>}, {transform_indices = @transform_6, window_bounds = array<i64: 16, 128>}]} {
    %c0_i32 = arith.constant 0 : i32
    %0 = arith.cmpi eq, %arg1, %c0_i32 : i32
    %1 = arith.extui %0 : i1 to i32
    %c0_i32_0 = arith.constant 0 : i32
    %2 = arith.cmpi ne, %1, %c0_i32_0 : i32
    scf.if %2 {
      %cst_10 = arith.constant 0.000000e+00 : f32
      %12 = vector.broadcast %cst_10 : f32 to vector<16x128xf32>
      %c0_11 = arith.constant 0 : index
      %c0_12 = arith.constant 0 : index
      %13 = vector.load %arg9[%c0_11, %c0_12] : memref<16x128xf32, #tpu.memory_space<vmem>>, vector<16x128xf32>
      tpu.vector_store %arg9[%c0_11, %c0_12], %12 {strides = array<i32>} : memref<16x128xf32, #tpu.memory_space<vmem>>, vector<16x128xf32>,
    } else {
    }
    %c0 = arith.constant 0 : index
    %c0_1 = arith.constant 0 : index
    %3 = vector.load %arg9[%c0, %c0_1] : memref<16x128xf32, #tpu.memory_space<vmem>>, vector<16x128xf32>
    %c0_2 = arith.constant 0 : index
    %c0_3 = arith.constant 0 : index
    %4 = vector.load %arg2[%c0_2, %c0_3] : memref<16x256xbf16, #tpu.memory_space<vmem>>, vector<16x256xbf16>
    %c0_4 = arith.constant 0 : index
    %c0_5 = arith.constant 0 : index
    %5 = vector.load %arg3[%c0_4, %c0_5] : memref<256x128xbf16, #tpu.memory_space<vmem>>, vector<256x128xbf16>
    %cst = arith.constant dense<0.000000e+00> : vector<16x128xf32>
    %6 = tpu.matmul %4, %5, %cst {dimension_numbers = #tpu.dot_dimension_numbers<[1], [0], [0], [1], [0, 0, 1, 1], [], []>} : vector<16x256xbf16>, vector<256x128xbf16>, vector<16x128xf32> -> vector<16x128xf32>
    %7 = arith.addf %3, %6 : vector<16x128xf32>
    %c0_6 = arith.constant 0 : index
    %c0_7 = arith.constant 0 : index
    %8 = vector.load %arg9[%c0_6, %c0_7] : memref<16x128xf32, #tpu.memory_space<vmem>>, vector<16x128xf32>
    tpu.vector_store %arg9[%c0_6, %c0_7], %7 {strides = array<i32>} : memref<16x128xf32, #tpu.memory_space<vmem>>, vector<16x128xf32>,
    %c0_i32_8 = arith.constant 0 : i32
    %9 = arith.cmpi eq, %arg1, %c0_i32_8 : i32
    %10 = arith.extui %9 : i1 to i32
    %c0_i32_9 = arith.constant 0 : i32
    %11 = arith.cmpi ne, %10, %c0_i32_9 : i32
    scf.if %11 {
      %c0_10 = arith.constant 0 : index
      %c0_11 = arith.constant 0 : index
      %12 = vector.load %arg9[%c0_10, %c0_11] : memref<16x128xf32, #tpu.memory_space<vmem>>, vector<16x128xf32>
      %c0_12 = arith.constant 0 : index
      %c0_13 = arith.constant 0 : index
      %13 = vector.load %arg4[%c0_12, %c0_13] : memref<1x128xf32, #tpu.memory_space<vmem>>, vector<1x128xf32>
      %14 = vector.broadcast %13 : vector<1x128xf32> to vector<16x128xf32>
      %15 = arith.addf %12, %14 : vector<16x128xf32>
      %c0_14 = arith.constant 0 : index
      %c0_15 = arith.constant 0 : index
      %16 = vector.load %arg5[%c0_14, %c0_15] : memref<16x128xbf16, #tpu.memory_space<vmem>>, vector<16x128xbf16>
      %17 = arith.extf %16 : vector<16x128xbf16> to vector<16x128xf32>
      %18 = arith.addf %15, %17 : vector<16x128xf32>
      %cst_16 = arith.constant dense<0.000000e+00> : vector<16xf32>
      %19 = vector.multi_reduction <add>, %18, %cst_16 [1] : vector<16x128xf32> to vector<16xf32>
      %20 = vector.shape_cast %19 : vector<16xf32> to vector<16x1xf32>
      %cst_17 = arith.constant 1.280000e+02 : f32
      %21 = vector.broadcast %cst_17 : f32 to vector<16x1xf32>
      %22 = arith.divf %20, %21 : vector<16x1xf32>
      %23 = vector.broadcast %22 : vector<16x1xf32> to vector<16x128xf32>
      %24 = arith.subf %18, %23 : vector<16x128xf32>
      %25 = arith.mulf %24, %24 : vector<16x128xf32>
      %cst_18 = arith.constant dense<0.000000e+00> : vector<16xf32>
      %26 = vector.multi_reduction <add>, %25, %cst_18 [1] : vector<16x128xf32> to vector<16xf32>
      %27 = vector.shape_cast %26 : vector<16xf32> to vector<16x1xf32>
      %cst_19 = arith.constant 1.280000e+02 : f32
      %28 = vector.broadcast %cst_19 : f32 to vector<16x1xf32>
      %29 = arith.divf %27, %28 : vector<16x1xf32>
      %30 = vector.broadcast %22 : vector<16x1xf32> to vector<16x128xf32>
      %31 = arith.subf %18, %30 : vector<16x128xf32>
      %cst_20 = arith.constant 9.99999974E-6 : f32
      %32 = vector.broadcast %cst_20 : f32 to vector<16x1xf32>
      %33 = arith.addf %29, %32 : vector<16x1xf32>
      %34 = math.rsqrt %33 : vector<16x1xf32>
      %35 = vector.broadcast %34 : vector<16x1xf32> to vector<16x128xf32>
      %36 = arith.mulf %31, %35 : vector<16x128xf32>
      %c0_21 = arith.constant 0 : index
      %c0_22 = arith.constant 0 : index
      %37 = vector.load %arg6[%c0_21, %c0_22] : memref<1x128xf32, #tpu.memory_space<vmem>>, vector<1x128xf32>
      %38 = vector.broadcast %37 : vector<1x128xf32> to vector<16x128xf32>
      %39 = arith.mulf %36, %38 : vector<16x128xf32>
      %c0_23 = arith.constant 0 : index
      %c0_24 = arith.constant 0 : index
      %40 = vector.load %arg7[%c0_23, %c0_24] : memref<1x128xf32, #tpu.memory_space<vmem>>, vector<1x128xf32>
      %41 = vector.broadcast %40 : vector<1x128xf32> to vector<16x128xf32>
      %42 = arith.addf %39, %41 : vector<16x128xf32>
      %43 = arith.truncf %42 : vector<16x128xf32> to vector<16x128xbf16>
      %c0_25 = arith.constant 0 : index
      %c0_26 = arith.constant 0 : index
      %44 = vector.load %arg8[%c0_25, %c0_26] : memref<16x128xbf16, #tpu.memory_space<vmem>>, vector<16x128xbf16>
      tpu.vector_store %arg8[%c0_25, %c0_26], %43 {strides = array<i32>} : memref<16x128xbf16, #tpu.memory_space<vmem>>, vector<16x128xbf16>,
    } else {
    }
    return
  }
  func.func @transform_0(%arg0: i32, %arg1: i32) -> (i32, i32) {
    %c0_i32 = arith.constant 0 : i32
    return %arg0, %arg1 : i32, i32
  }
  func.func @transform_1(%arg0: i32, %arg1: i32) -> (i32, i32) {
    %c0_i32 = arith.constant 0 : i32
    %c0_i32_0 = arith.constant 0 : i32
    return %arg1, %c0_i32 : i32, i32
  }
  func.func @transform_2(%arg0: i32, %arg1: i32) -> (i32, i32) {
    %c0_i32 = arith.constant 0 : i32
    %c0_i32_0 = arith.constant 0 : i32
    %c0_i32_1 = arith.constant 0 : i32
    return %c0_i32, %c0_i32_0 : i32, i32
  }
  func.func @transform_3(%arg0: i32, %arg1: i32) -> (i32, i32) {
    %c0_i32 = arith.constant 0 : i32
    %c0_i32_0 = arith.constant 0 : i32
    return %arg0, %c0_i32 : i32, i32
  }
  func.func @transform_4(%arg0: i32, %arg1: i32) -> (i32, i32) {
    %c0_i32 = arith.constant 0 : i32
    %c0_i32_0 = arith.constant 0 : i32
    %c0_i32_1 = arith.constant 0 : i32
    return %c0_i32, %c0_i32_0 : i32, i32
  }
  func.func @transform_5(%arg0: i32, %arg1: i32) -> (i32, i32) {
    %c0_i32 = arith.constant 0 : i32
    %c0_i32_0 = arith.constant 0 : i32
    %c0_i32_1 = arith.constant 0 : i32
    return %c0_i32, %c0_i32_0 : i32, i32
  }
  func.func @transform_6(%arg0: i32, %arg1: i32) -> (i32, i32) {
    %c0_i32 = arith.constant 0 : i32
    %c0_i32_0 = arith.constant 0 : i32
    return %arg0, %c0_i32 : i32, i32
  }
}

module attributes {stable_mosaic.version = 11 : i64} {
  func.func @_layernorm_kernel(%arg0: i32, %arg1: memref<16x128xbf16, #tpu.memory_space<vmem>>, %arg2: memref<1x128xf32, #tpu.memory_space<vmem>>, %arg3: memref<1x128xf32, #tpu.memory_space<vmem>>, %arg4: memref<16x128xbf16, #tpu.memory_space<vmem>>) attributes {dimension_semantics = [#tpu.dimension_semantics<parallel>], iteration_bounds = array<i64: 1>, scalar_prefetch = 0 : i64, scratch_operands = 0 : i64, tpu.core_type = #tpu.core_type<tc>, window_params = [{transform_indices = @transform_0, window_bounds = array<i64: 16, 128>}, {pipeline_mode = #tpu.pipeline_mode<synchronous>, transform_indices = @transform_1, window_bounds = array<i64: 1, 128>}, {pipeline_mode = #tpu.pipeline_mode<synchronous>, transform_indices = @transform_2, window_bounds = array<i64: 1, 128>}, {transform_indices = @transform_3, window_bounds = array<i64: 16, 128>}]} {
    %c0 = arith.constant 0 : index
    %c0_0 = arith.constant 0 : index
    %0 = vector.load %arg1[%c0, %c0_0] : memref<16x128xbf16, #tpu.memory_space<vmem>>, vector<16x128xbf16>
    %1 = arith.extf %0 : vector<16x128xbf16> to vector<16x128xf32>
    %cst = arith.constant dense<0.000000e+00> : vector<16xf32>
    %2 = vector.multi_reduction <add>, %1, %cst [1] : vector<16x128xf32> to vector<16xf32>
    %3 = vector.shape_cast %2 : vector<16xf32> to vector<16x1xf32>
    %cst_1 = arith.constant 1.280000e+02 : f32
    %4 = vector.broadcast %cst_1 : f32 to vector<16x1xf32>
    %5 = arith.divf %3, %4 : vector<16x1xf32>
    %6 = vector.broadcast %5 : vector<16x1xf32> to vector<16x128xf32>
    %7 = arith.subf %1, %6 : vector<16x128xf32>
    %8 = arith.mulf %7, %7 : vector<16x128xf32>
    %cst_2 = arith.constant dense<0.000000e+00> : vector<16xf32>
    %9 = vector.multi_reduction <add>, %8, %cst_2 [1] : vector<16x128xf32> to vector<16xf32>
    %10 = vector.shape_cast %9 : vector<16xf32> to vector<16x1xf32>
    %cst_3 = arith.constant 1.280000e+02 : f32
    %11 = vector.broadcast %cst_3 : f32 to vector<16x1xf32>
    %12 = arith.divf %10, %11 : vector<16x1xf32>
    %13 = vector.broadcast %5 : vector<16x1xf32> to vector<16x128xf32>
    %14 = arith.subf %1, %13 : vector<16x128xf32>
    %cst_4 = arith.constant 9.99999974E-6 : f32
    %15 = vector.broadcast %cst_4 : f32 to vector<16x1xf32>
    %16 = arith.addf %12, %15 : vector<16x1xf32>
    %17 = math.rsqrt %16 : vector<16x1xf32>
    %18 = vector.broadcast %17 : vector<16x1xf32> to vector<16x128xf32>
    %19 = arith.mulf %14, %18 : vector<16x128xf32>
    %c0_5 = arith.constant 0 : index
    %c0_6 = arith.constant 0 : index
    %20 = vector.load %arg2[%c0_5, %c0_6] : memref<1x128xf32, #tpu.memory_space<vmem>>, vector<1x128xf32>
    %21 = vector.broadcast %20 : vector<1x128xf32> to vector<16x128xf32>
    %22 = arith.mulf %19, %21 : vector<16x128xf32>
    %c0_7 = arith.constant 0 : index
    %c0_8 = arith.constant 0 : index
    %23 = vector.load %arg3[%c0_7, %c0_8] : memref<1x128xf32, #tpu.memory_space<vmem>>, vector<1x128xf32>
    %24 = vector.broadcast %23 : vector<1x128xf32> to vector<16x128xf32>
    %25 = arith.addf %22, %24 : vector<16x128xf32>
    %26 = arith.truncf %25 : vector<16x128xf32> to vector<16x128xbf16>
    %c0_9 = arith.constant 0 : index
    %c0_10 = arith.constant 0 : index
    %27 = vector.load %arg4[%c0_9, %c0_10] : memref<16x128xbf16, #tpu.memory_space<vmem>>, vector<16x128xbf16>
    tpu.vector_store %arg4[%c0_9, %c0_10], %26 {strides = array<i32>} : memref<16x128xbf16, #tpu.memory_space<vmem>>, vector<16x128xbf16>,
    return
  }
  func.func @transform_0(%arg0: i32) -> (i32, i32) {
    %c0_i32 = arith.constant 0 : i32
    %c0_i32_0 = arith.constant 0 : i32
    return %arg0, %c0_i32 : i32, i32
  }
  func.func @transform_1(%arg0: i32) -> (i32, i32) {
    %c0_i32 = arith.constant 0 : i32
    %c0_i32_0 = arith.constant 0 : i32
    %c0_i32_1 = arith.constant 0 : i32
    return %c0_i32, %c0_i32_0 : i32, i32
  }
  func.func @transform_2(%arg0: i32) -> (i32, i32) {
    %c0_i32 = arith.constant 0 : i32
    %c0_i32_0 = arith.constant 0 : i32
    %c0_i32_1 = arith.constant 0 : i32
    return %c0_i32, %c0_i32_0 : i32, i32
  }
  func.func @transform_3(%arg0: i32) -> (i32, i32) {
    %c0_i32 = arith.constant 0 : i32
    %c0_i32_0 = arith.constant 0 : i32
    return %arg0, %c0_i32 : i32, i32
  }
}

module attributes {stable_mosaic.version = 11 : i64} {
  func.func @_linear_kernel(%arg0: i32, %arg1: i32, %arg2: i32, %arg3: memref<16x128xbf16, #tpu.memory_space<vmem>>, %arg4: memref<128x256xbf16, #tpu.memory_space<vmem>>, %arg5: memref<1x256xf32, #tpu.memory_space<vmem>>, %arg6: memref<16x256xbf16, #tpu.memory_space<vmem>>, %arg7: memref<16x256xf32, #tpu.memory_space<vmem>>) attributes {dimension_semantics = [#tpu.dimension_semantics<parallel>, #tpu.dimension_semantics<parallel>, #tpu.dimension_semantics<arbitrary>], iteration_bounds = array<i64: 1, 1, 1>, scalar_prefetch = 0 : i64, scratch_operands = 1 : i64, tpu.core_type = #tpu.core_type<tc>, window_params = [{transform_indices = @transform_0, window_bounds = array<i64: 16, 128>}, {transform_indices = @transform_1, window_bounds = array<i64: 128, 256>}, {transform_indices = @transform_2, window_bounds = array<i64: 1, 256>}, {transform_indices = @transform_3, window_bounds = array<i64: 16, 256>}]} {
    %c0_i32 = arith.constant 0 : i32
    %0 = arith.cmpi eq, %arg2, %c0_i32 : i32
    %1 = arith.extui %0 : i1 to i32
    %c0_i32_0 = arith.constant 0 : i32
    %2 = arith.cmpi ne, %1, %c0_i32_0 : i32
    scf.if %2 {
      %cst_10 = arith.constant 0.000000e+00 : f32
      %12 = vector.broadcast %cst_10 : f32 to vector<16x256xf32>
      %c0_11 = arith.constant 0 : index
      %c0_12 = arith.constant 0 : index
      %13 = vector.load %arg7[%c0_11, %c0_12] : memref<16x256xf32, #tpu.memory_space<vmem>>, vector<16x256xf32>
      tpu.vector_store %arg7[%c0_11, %c0_12], %12 {strides = array<i32>} : memref<16x256xf32, #tpu.memory_space<vmem>>, vector<16x256xf32>,
    } else {
    }
    %c0 = arith.constant 0 : index
    %c0_1 = arith.constant 0 : index
    %3 = vector.load %arg7[%c0, %c0_1] : memref<16x256xf32, #tpu.memory_space<vmem>>, vector<16x256xf32>
    %c0_2 = arith.constant 0 : index
    %c0_3 = arith.constant 0 : index
    %4 = vector.load %arg3[%c0_2, %c0_3] : memref<16x128xbf16, #tpu.memory_space<vmem>>, vector<16x128xbf16>
    %c0_4 = arith.constant 0 : index
    %c0_5 = arith.constant 0 : index
    %5 = vector.load %arg4[%c0_4, %c0_5] : memref<128x256xbf16, #tpu.memory_space<vmem>>, vector<128x256xbf16>
    %cst = arith.constant dense<0.000000e+00> : vector<16x256xf32>
    %6 = tpu.matmul %4, %5, %cst {dimension_numbers = #tpu.dot_dimension_numbers<[1], [0], [0], [1], [0, 0, 1, 1], [], []>} : vector<16x128xbf16>, vector<128x256xbf16>, vector<16x256xf32> -> vector<16x256xf32>
    %7 = arith.addf %3, %6 : vector<16x256xf32>
    %c0_6 = arith.constant 0 : index
    %c0_7 = arith.constant 0 : index
    %8 = vector.load %arg7[%c0_6, %c0_7] : memref<16x256xf32, #tpu.memory_space<vmem>>, vector<16x256xf32>
    tpu.vector_store %arg7[%c0_6, %c0_7], %7 {strides = array<i32>} : memref<16x256xf32, #tpu.memory_space<vmem>>, vector<16x256xf32>,
    %c0_i32_8 = arith.constant 0 : i32
    %9 = arith.cmpi eq, %arg2, %c0_i32_8 : i32
    %10 = arith.extui %9 : i1 to i32
    %c0_i32_9 = arith.constant 0 : i32
    %11 = arith.cmpi ne, %10, %c0_i32_9 : i32
    scf.if %11 {
      %c0_10 = arith.constant 0 : index
      %c0_11 = arith.constant 0 : index
      %12 = vector.load %arg7[%c0_10, %c0_11] : memref<16x256xf32, #tpu.memory_space<vmem>>, vector<16x256xf32>
      %c0_12 = arith.constant 0 : index
      %c0_13 = arith.constant 0 : index
      %13 = vector.load %arg5[%c0_12, %c0_13] : memref<1x256xf32, #tpu.memory_space<vmem>>, vector<1x256xf32>
      %14 = vector.broadcast %13 : vector<1x256xf32> to vector<16x256xf32>
      %15 = arith.addf %12, %14 : vector<16x256xf32>
      %16 = arith.truncf %15 : vector<16x256xf32> to vector<16x256xbf16>
      %c0_14 = arith.constant 0 : index
      %c0_15 = arith.constant 0 : index
      %17 = vector.load %arg6[%c0_14, %c0_15] : memref<16x256xbf16, #tpu.memory_space<vmem>>, vector<16x256xbf16>
      tpu.vector_store %arg6[%c0_14, %c0_15], %16 {strides = array<i32>} : memref<16x256xbf16, #tpu.memory_space<vmem>>, vector<16x256xbf16>,
    } else {
    }
    return
  }
  func.func @transform_0(%arg0: i32, %arg1: i32, %arg2: i32) -> (i32, i32) {
    %c0_i32 = arith.constant 0 : i32
    return %arg0, %arg2 : i32, i32
  }
  func.func @transform_1(%arg0: i32, %arg1: i32, %arg2: i32) -> (i32, i32) {
    %c0_i32 = arith.constant 0 : i32
    return %arg2, %arg1 : i32, i32
  }
  func.func @transform_2(%arg0: i32, %arg1: i32, %arg2: i32) -> (i32, i32) {
    %c0_i32 = arith.constant 0 : i32
    %c0_i32_0 = arith.constant 0 : i32
    return %c0_i32, %arg1 : i32, i32
  }
  func.func @transform_3(%arg0: i32, %arg1: i32, %arg2: i32) -> (i32, i32) {
    %c0_i32 = arith.constant 0 : i32
    return %arg0, %arg1 : i32, i32
  }
}

module attributes {stable_mosaic.version = 11 : i64} {
  func.func @_flash_attn_kernel(%arg0: i32, %arg1: i32, %arg2: i32, %arg3: memref<1x16x32xbf16, #tpu.memory_space<vmem>>, %arg4: memref<1x16x32xbf16, #tpu.memory_space<vmem>>, %arg5: memref<1x16x32xbf16, #tpu.memory_space<vmem>>, %arg6: memref<1x16x32xbf16, #tpu.memory_space<vmem>>, %arg7: memref<16x1xf32, #tpu.memory_space<vmem>>, %arg8: memref<16x1xf32, #tpu.memory_space<vmem>>, %arg9: memref<16x32xf32, #tpu.memory_space<vmem>>) attributes {dimension_semantics = [#tpu.dimension_semantics<parallel>, #tpu.dimension_semantics<parallel>, #tpu.dimension_semantics<arbitrary>], iteration_bounds = array<i64: 8, 1, 1>, scalar_prefetch = 0 : i64, scratch_operands = 3 : i64, tpu.core_type = #tpu.core_type<tc>, window_params = [{transform_indices = @transform_0, window_bounds = array<i64: 1, 16, 32>}, {transform_indices = @transform_1, window_bounds = array<i64: 1, 16, 32>}, {transform_indices = @transform_2, window_bounds = array<i64: 1, 16, 32>}, {transform_indices = @transform_3, window_bounds = array<i64: 1, 16, 32>}]} {
    %c0_i32 = arith.constant 0 : i32
    %0 = arith.cmpi eq, %arg2, %c0_i32 : i32
    %1 = arith.extui %0 : i1 to i32
    %c0_i32_0 = arith.constant 0 : i32
    %2 = arith.cmpi ne, %1, %c0_i32_0 : i32
    scf.if %2 {
      %cst_28 = arith.constant -1.000000e+30 : f32
      %50 = vector.broadcast %cst_28 : f32 to vector<16x1xf32>
      %c0_29 = arith.constant 0 : index
      %c0_30 = arith.constant 0 : index
      %51 = vector.load %arg7[%c0_29, %c0_30] : memref<16x1xf32, #tpu.memory_space<vmem>>, vector<16x1xf32>
      tpu.vector_store %arg7[%c0_29, %c0_30], %50 {strides = array<i32>} : memref<16x1xf32, #tpu.memory_space<vmem>>, vector<16x1xf32>,
      %cst_31 = arith.constant 0.000000e+00 : f32
      %52 = vector.broadcast %cst_31 : f32 to vector<16x1xf32>
      %c0_32 = arith.constant 0 : index
      %c0_33 = arith.constant 0 : index
      %53 = vector.load %arg8[%c0_32, %c0_33] : memref<16x1xf32, #tpu.memory_space<vmem>>, vector<16x1xf32>
      tpu.vector_store %arg8[%c0_32, %c0_33], %52 {strides = array<i32>} : memref<16x1xf32, #tpu.memory_space<vmem>>, vector<16x1xf32>,
      %cst_34 = arith.constant 0.000000e+00 : f32
      %54 = vector.broadcast %cst_34 : f32 to vector<16x32xf32>
      %c0_35 = arith.constant 0 : index
      %c0_36 = arith.constant 0 : index
      %55 = vector.load %arg9[%c0_35, %c0_36] : memref<16x32xf32, #tpu.memory_space<vmem>>, vector<16x32xf32>
      tpu.vector_store %arg9[%c0_35, %c0_36], %54 {strides = array<i32>} : memref<16x32xf32, #tpu.memory_space<vmem>>, vector<16x32xf32>,
    } else {
    }
    %c0 = arith.constant 0 : index
    %c0_1 = arith.constant 0 : index
    %c0_2 = arith.constant 0 : index
    %3 = vector.load %arg3[%c0, %c0_1, %c0_2] : memref<1x16x32xbf16, #tpu.memory_space<vmem>>, vector<1x16x32xbf16>
    %4 = vector.shape_cast %3 : vector<1x16x32xbf16> to vector<16x32xbf16>
    %c0_3 = arith.constant 0 : index
    %c0_4 = arith.constant 0 : index
    %c0_5 = arith.constant 0 : index
    %5 = vector.load %arg4[%c0_3, %c0_4, %c0_5] : memref<1x16x32xbf16, #tpu.memory_space<vmem>>, vector<1x16x32xbf16>
    %6 = vector.shape_cast %5 : vector<1x16x32xbf16> to vector<16x32xbf16>
    %cst = arith.constant dense<0.000000e+00> : vector<16x16xf32>
    %7 = tpu.matmul %4, %6, %cst {dimension_numbers = #tpu.dot_dimension_numbers<[1], [1], [0], [0], [0, 0, 1, 0], [], []>} : vector<16x32xbf16>, vector<16x32xbf16>, vector<16x16xf32> -> vector<16x16xf32>
    %c16_i32 = arith.constant 16 : i32
    %8 = arith.muli %arg2, %c16_i32 : i32
    %9 = tpu.iota {dimensions = array<i32: 1>} : vector<16x16xi32>
    %10 = vector.broadcast %8 : i32 to vector<16x16xi32>
    %11 = arith.addi %10, %9 : vector<16x16xi32>
    %c16_i32_6 = arith.constant 16 : i32
    %12 = arith.muli %arg1, %c16_i32_6 : i32
    %13 = tpu.iota {dimensions = array<i32: 0>} : vector<16x16xi32>
    %14 = vector.broadcast %12 : i32 to vector<16x16xi32>
    %15 = arith.addi %14, %13 : vector<16x16xi32>
    %16 = arith.cmpi sgt, %11, %15 : vector<16x16xi32>
    %c8_i32 = arith.constant 8 : i32
    %17 = vector.broadcast %c8_i32 : i32 to vector<16x16xi32>
    %18 = arith.cmpi sge, %11, %17 : vector<16x16xi32>
    %19 = arith.ori %16, %18 : vector<16x16xi1>
    %cst_7 = arith.constant -1.000000e+30 : f32
    %20 = vector.broadcast %cst_7 : f32 to vector<16x16xf32>
    %21 = arith.select %19, %20, %7 : vector<16x16xi1>, vector<16x16xf32>
    %c0_8 = arith.constant 0 : index
    %c0_9 = arith.constant 0 : index
    %22 = vector.load %arg7[%c0_8, %c0_9] : memref<16x1xf32, #tpu.memory_space<vmem>>, vector<16x1xf32>
    %cst_10 = arith.constant dense<0xFF800000> : vector<16xf32>
    %23 = vector.multi_reduction <maximumf>, %21, %cst_10 [1] : vector<16x16xf32> to vector<16xf32>
    %24 = vector.shape_cast %23 : vector<16xf32> to vector<16x1xf32>
    %25 = arith.maximumf %22, %24 : vector<16x1xf32>
    %26 = arith.subf %22, %25 : vector<16x1xf32>
    %27 = math.exp %26 : vector<16x1xf32>
    %28 = vector.broadcast %25 : vector<16x1xf32> to vector<16x16xf32>
    %29 = arith.subf %21, %28 : vector<16x16xf32>
    %30 = math.exp %29 : vector<16x16xf32>
    %c0_11 = arith.constant 0 : index
    %c0_12 = arith.constant 0 : index
    %31 = vector.load %arg8[%c0_11, %c0_12] : memref<16x1xf32, #tpu.memory_space<vmem>>, vector<16x1xf32>
    %32 = arith.mulf %27, %31 : vector<16x1xf32>
    %cst_13 = arith.constant dense<0.000000e+00> : vector<16xf32>
    %33 = vector.multi_reduction <add>, %30, %cst_13 [1] : vector<16x16xf32> to vector<16xf32>
    %34 = vector.shape_cast %33 : vector<16xf32> to vector<16x1xf32>
    %35 = arith.addf %32, %34 : vector<16x1xf32>
    %c0_14 = arith.constant 0 : index
    %c0_15 = arith.constant 0 : index
    %36 = vector.load %arg8[%c0_14, %c0_15] : memref<16x1xf32, #tpu.memory_space<vmem>>, vector<16x1xf32>
    tpu.vector_store %arg8[%c0_14, %c0_15], %35 {strides = array<i32>} : memref<16x1xf32, #tpu.memory_space<vmem>>, vector<16x1xf32>,
    %c0_16 = arith.constant 0 : index
    %c0_17 = arith.constant 0 : index
    %37 = vector.load %arg9[%c0_16, %c0_17] : memref<16x32xf32, #tpu.memory_space<vmem>>, vector<16x32xf32>
    %38 = vector.broadcast %27 : vector<16x1xf32> to vector<16x32xf32>
    %39 = arith.mulf %38, %37 : vector<16x32xf32>
    %40 = arith.truncf %30 : vector<16x16xf32> to vector<16x16xbf16>
    %c0_18 = arith.constant 0 : index
    %c0_19 = arith.constant 0 : index
    %c0_20 = arith.constant 0 : index
    %41 = vector.load %arg5[%c0_18, %c0_19, %c0_20] : memref<1x16x32xbf16, #tpu.memory_space<vmem>>, vector<1x16x32xbf16>
    %42 = vector.shape_cast %41 : vector<1x16x32xbf16> to vector<16x32xbf16>
    %cst_21 = arith.constant dense<0.000000e+00> : vector<16x32xf32>
    %43 = tpu.matmul %40, %42, %cst_21 {dimension_numbers = #tpu.dot_dimension_numbers<[1], [0], [0], [1], [0, 0, 1, 1], [], []>} : vector<16x16xbf16>, vector<16x32xbf16>, vector<16x32xf32> -> vector<16x32xf32>
    %44 = arith.addf %39, %43 : vector<16x32xf32>
    %c0_22 = arith.constant 0 : index
    %c0_23 = arith.constant 0 : index
    %45 = vector.load %arg9[%c0_22, %c0_23] : memref<16x32xf32, #tpu.memory_space<vmem>>, vector<16x32xf32>
    tpu.vector_store %arg9[%c0_22, %c0_23], %44 {strides = array<i32>} : memref<16x32xf32, #tpu.memory_space<vmem>>, vector<16x32xf32>,
    %c0_24 = arith.constant 0 : index
    %c0_25 = arith.constant 0 : index
    %46 = vector.load %arg7[%c0_24, %c0_25] : memref<16x1xf32, #tpu.memory_space<vmem>>, vector<16x1xf32>
    tpu.vector_store %arg7[%c0_24, %c0_25], %25 {strides = array<i32>} : memref<16x1xf32, #tpu.memory_space<vmem>>, vector<16x1xf32>,
    %c0_i32_26 = arith.constant 0 : i32
    %47 = arith.cmpi eq, %arg2, %c0_i32_26 : i32
    %48 = arith.extui %47 : i1 to i32
    %c0_i32_27 = arith.constant 0 : i32
    %49 = arith.cmpi ne, %48, %c0_i32_27 : i32
    scf.if %49 {
      %c0_28 = arith.constant 0 : index
      %c0_29 = arith.constant 0 : index
      %50 = vector.load %arg8[%c0_28, %c0_29] : memref<16x1xf32, #tpu.memory_space<vmem>>, vector<16x1xf32>
      %51 = tpu.reciprocal %50 {approx = true} : vector<16x1xf32> -> vector<16x1xf32>
      %c0_30 = arith.constant 0 : index
      %c0_31 = arith.constant 0 : index
      %52 = vector.load %arg9[%c0_30, %c0_31] : memref<16x32xf32, #tpu.memory_space<vmem>>, vector<16x32xf32>
      %53 = vector.broadcast %51 : vector<16x1xf32> to vector<16x32xf32>
      %54 = arith.mulf %52, %53 : vector<16x32xf32>
      %55 = arith.truncf %54 : vector<16x32xf32> to vector<16x32xbf16>
      %c0_32 = arith.constant 0 : index
      %c0_33 = arith.constant 0 : index
      %c0_34 = arith.constant 0 : index
      %56 = vector.load %arg6[%c0_32, %c0_33, %c0_34] : memref<1x16x32xbf16, #tpu.memory_space<vmem>>, vector<1x16x32xbf16>
      %57 = vector.shape_cast %56 : vector<1x16x32xbf16> to vector<16x32xbf16>
      %58 = vector.shape_cast %55 : vector<16x32xbf16> to vector<1x16x32xbf16>
      tpu.vector_store %arg6[%c0_32, %c0_33, %c0_34], %58 {strides = array<i32>} : memref<1x16x32xbf16, #tpu.memory_space<vmem>>, vector<1x16x32xbf16>,
    } else {
    }
    return
  }
  func.func @transform_0(%arg0: i32, %arg1: i32, %arg2: i32) -> (i32, i32, i32) {
    %c0_i32 = arith.constant 0 : i32
    %c0_i32_0 = arith.constant 0 : i32
    return %arg0, %arg1, %c0_i32 : i32, i32, i32
  }
  func.func @transform_1(%arg0: i32, %arg1: i32, %arg2: i32) -> (i32, i32, i32) {
    %c0_i32 = arith.constant 0 : i32
    %c0_i32_0 = arith.constant 0 : i32
    return %arg0, %arg2, %c0_i32 : i32, i32, i32
  }
  func.func @transform_2(%arg0: i32, %arg1: i32, %arg2: i32) -> (i32, i32, i32) {
    %c0_i32 = arith.constant 0 : i32
    %c0_i32_0 = arith.constant 0 : i32
    return %arg0, %arg2, %c0_i32 : i32, i32, i32
  }
  func.func @transform_3(%arg0: i32, %arg1: i32, %arg2: i32) -> (i32, i32, i32) {
    %c0_i32 = arith.constant 0 : i32
    %c0_i32_0 = arith.constant 0 : i32
    return %arg0, %arg1, %c0_i32 : i32, i32, i32
  }
}

module attributes {stable_mosaic.version = 11 : i64} {
  func.func @_linear_kernel(%arg0: i32, %arg1: i32, %arg2: i32, %arg3: memref<16x128xbf16, #tpu.memory_space<vmem>>, %arg4: memref<128x128xbf16, #tpu.memory_space<vmem>>, %arg5: memref<1x128xf32, #tpu.memory_space<vmem>>, %arg6: memref<16x128xbf16, #tpu.memory_space<vmem>>, %arg7: memref<16x128xf32, #tpu.memory_space<vmem>>) attributes {dimension_semantics = [#tpu.dimension_semantics<parallel>, #tpu.dimension_semantics<parallel>, #tpu.dimension_semantics<arbitrary>], iteration_bounds = array<i64: 1, 1, 1>, scalar_prefetch = 0 : i64, scratch_operands = 1 : i64, tpu.core_type = #tpu.core_type<tc>, window_params = [{transform_indices = @transform_0, window_bounds = array<i64: 16, 128>}, {transform_indices = @transform_1, window_bounds = array<i64: 128, 128>}, {transform_indices = @transform_2, window_bounds = array<i64: 1, 128>}, {transform_indices = @transform_3, window_bounds = array<i64: 16, 128>}]} {
    %c0_i32 = arith.constant 0 : i32
    %0 = arith.cmpi eq, %arg2, %c0_i32 : i32
    %1 = arith.extui %0 : i1 to i32
    %c0_i32_0 = arith.constant 0 : i32
    %2 = arith.cmpi ne, %1, %c0_i32_0 : i32
    scf.if %2 {
      %cst_10 = arith.constant 0.000000e+00 : f32
      %12 = vector.broadcast %cst_10 : f32 to vector<16x128xf32>
      %c0_11 = arith.constant 0 : index
      %c0_12 = arith.constant 0 : index
      %13 = vector.load %arg7[%c0_11, %c0_12] : memref<16x128xf32, #tpu.memory_space<vmem>>, vector<16x128xf32>
      tpu.vector_store %arg7[%c0_11, %c0_12], %12 {strides = array<i32>} : memref<16x128xf32, #tpu.memory_space<vmem>>, vector<16x128xf32>,
    } else {
    }
    %c0 = arith.constant 0 : index
    %c0_1 = arith.constant 0 : index
    %3 = vector.load %arg7[%c0, %c0_1] : memref<16x128xf32, #tpu.memory_space<vmem>>, vector<16x128xf32>
    %c0_2 = arith.constant 0 : index
    %c0_3 = arith.constant 0 : index
    %4 = vector.load %arg3[%c0_2, %c0_3] : memref<16x128xbf16, #tpu.memory_space<vmem>>, vector<16x128xbf16>
    %c0_4 = arith.constant 0 : index
    %c0_5 = arith.constant 0 : index
    %5 = vector.load %arg4[%c0_4, %c0_5] : memref<128x128xbf16, #tpu.memory_space<vmem>>, vector<128x128xbf16>
    %cst = arith.constant dense<0.000000e+00> : vector<16x128xf32>
    %6 = tpu.matmul %4, %5, %cst {dimension_numbers = #tpu.dot_dimension_numbers<[1], [0], [0], [1], [0, 0, 1, 1], [], []>} : vector<16x128xbf16>, vector<128x128xbf16>, vector<16x128xf32> -> vector<16x128xf32>
    %7 = arith.addf %3, %6 : vector<16x128xf32>
    %c0_6 = arith.constant 0 : index
    %c0_7 = arith.constant 0 : index
    %8 = vector.load %arg7[%c0_6, %c0_7] : memref<16x128xf32, #tpu.memory_space<vmem>>, vector<16x128xf32>
    tpu.vector_store %arg7[%c0_6, %c0_7], %7 {strides = array<i32>} : memref<16x128xf32, #tpu.memory_space<vmem>>, vector<16x128xf32>,
    %c0_i32_8 = arith.constant 0 : i32
    %9 = arith.cmpi eq, %arg2, %c0_i32_8 : i32
    %10 = arith.extui %9 : i1 to i32
    %c0_i32_9 = arith.constant 0 : i32
    %11 = arith.cmpi ne, %10, %c0_i32_9 : i32
    scf.if %11 {
      %c0_10 = arith.constant 0 : index
      %c0_11 = arith.constant 0 : index
      %12 = vector.load %arg7[%c0_10, %c0_11] : memref<16x128xf32, #tpu.memory_space<vmem>>, vector<16x128xf32>
      %c0_12 = arith.constant 0 : index
      %c0_13 = arith.constant 0 : index
      %13 = vector.load %arg5[%c0_12, %c0_13] : memref<1x128xf32, #tpu.memory_space<vmem>>, vector<1x128xf32>
      %14 = vector.broadcast %13 : vector<1x128xf32> to vector<16x128xf32>
      %15 = arith.addf %12, %14 : vector<16x128xf32>
      %16 = arith.truncf %15 : vector<16x128xf32> to vector<16x128xbf16>
      %c0_14 = arith.constant 0 : index
      %c0_15 = arith.constant 0 : index
      %17 = vector.load %arg6[%c0_14, %c0_15] : memref<16x128xbf16, #tpu.memory_space<vmem>>, vector<16x128xbf16>
      tpu.vector_store %arg6[%c0_14, %c0_15], %16 {strides = array<i32>} : memref<16x128xbf16, #tpu.memory_space<vmem>>, vector<16x128xbf16>,
    } else {
    }
    return
  }
  func.func @transform_0(%arg0: i32, %arg1: i32, %arg2: i32) -> (i32, i32) {
    %c0_i32 = arith.constant 0 : i32
    return %arg0, %arg2 : i32, i32
  }
  func.func @transform_1(%arg0: i32, %arg1: i32, %arg2: i32) -> (i32, i32) {
    %c0_i32 = arith.constant 0 : i32
    return %arg2, %arg1 : i32, i32
  }
  func.func @transform_2(%arg0: i32, %arg1: i32, %arg2: i32) -> (i32, i32) {
    %c0_i32 = arith.constant 0 : i32
    %c0_i32_0 = arith.constant 0 : i32
    return %c0_i32, %arg1 : i32, i32
  }
  func.func @transform_3(%arg0: i32, %arg1: i32, %arg2: i32) -> (i32, i32) {
    %c0_i32 = arith.constant 0 : i32
    return %arg0, %arg1 : i32, i32
  }
}

module attributes {stable_mosaic.version = 11 : i64} {
  func.func @_linear_kernel(%arg0: i32, %arg1: i32, %arg2: i32, %arg3: memref<16x128xbf16, #tpu.memory_space<vmem>>, %arg4: memref<128x128xbf16, #tpu.memory_space<vmem>>, %arg5: memref<1x128xf32, #tpu.memory_space<vmem>>, %arg6: memref<16x128xf32, #tpu.memory_space<vmem>>, %arg7: memref<16x128xf32, #tpu.memory_space<vmem>>) attributes {dimension_semantics = [#tpu.dimension_semantics<parallel>, #tpu.dimension_semantics<parallel>, #tpu.dimension_semantics<arbitrary>], iteration_bounds = array<i64: 1, 1, 1>, scalar_prefetch = 0 : i64, scratch_operands = 1 : i64, tpu.core_type = #tpu.core_type<tc>, window_params = [{transform_indices = @transform_0, window_bounds = array<i64: 16, 128>}, {transform_indices = @transform_1, window_bounds = array<i64: 128, 128>}, {transform_indices = @transform_2, window_bounds = array<i64: 1, 128>}, {transform_indices = @transform_3, window_bounds = array<i64: 16, 128>}]} {
    %c0_i32 = arith.constant 0 : i32
    %0 = arith.cmpi eq, %arg2, %c0_i32 : i32
    %1 = arith.extui %0 : i1 to i32
    %c0_i32_0 = arith.constant 0 : i32
    %2 = arith.cmpi ne, %1, %c0_i32_0 : i32
    scf.if %2 {
      %cst_10 = arith.constant 0.000000e+00 : f32
      %12 = vector.broadcast %cst_10 : f32 to vector<16x128xf32>
      %c0_11 = arith.constant 0 : index
      %c0_12 = arith.constant 0 : index
      %13 = vector.load %arg7[%c0_11, %c0_12] : memref<16x128xf32, #tpu.memory_space<vmem>>, vector<16x128xf32>
      tpu.vector_store %arg7[%c0_11, %c0_12], %12 {strides = array<i32>} : memref<16x128xf32, #tpu.memory_space<vmem>>, vector<16x128xf32>,
    } else {
    }
    %c0 = arith.constant 0 : index
    %c0_1 = arith.constant 0 : index
    %3 = vector.load %arg7[%c0, %c0_1] : memref<16x128xf32, #tpu.memory_space<vmem>>, vector<16x128xf32>
    %c0_2 = arith.constant 0 : index
    %c0_3 = arith.constant 0 : index
    %4 = vector.load %arg3[%c0_2, %c0_3] : memref<16x128xbf16, #tpu.memory_space<vmem>>, vector<16x128xbf16>
    %c0_4 = arith.constant 0 : index
    %c0_5 = arith.constant 0 : index
    %5 = vector.load %arg4[%c0_4, %c0_5] : memref<128x128xbf16, #tpu.memory_space<vmem>>, vector<128x128xbf16>
    %cst = arith.constant dense<0.000000e+00> : vector<16x128xf32>
    %6 = tpu.matmul %4, %5, %cst {dimension_numbers = #tpu.dot_dimension_numbers<[1], [0], [0], [1], [0, 0, 1, 1], [], []>} : vector<16x128xbf16>, vector<128x128xbf16>, vector<16x128xf32> -> vector<16x128xf32>
    %7 = arith.addf %3, %6 : vector<16x128xf32>
    %c0_6 = arith.constant 0 : index
    %c0_7 = arith.constant 0 : index
    %8 = vector.load %arg7[%c0_6, %c0_7] : memref<16x128xf32, #tpu.memory_space<vmem>>, vector<16x128xf32>
    tpu.vector_store %arg7[%c0_6, %c0_7], %7 {strides = array<i32>} : memref<16x128xf32, #tpu.memory_space<vmem>>, vector<16x128xf32>,
    %c0_i32_8 = arith.constant 0 : i32
    %9 = arith.cmpi eq, %arg2, %c0_i32_8 : i32
    %10 = arith.extui %9 : i1 to i32
    %c0_i32_9 = arith.constant 0 : i32
    %11 = arith.cmpi ne, %10, %c0_i32_9 : i32
    scf.if %11 {
      %c0_10 = arith.constant 0 : index
      %c0_11 = arith.constant 0 : index
      %12 = vector.load %arg7[%c0_10, %c0_11] : memref<16x128xf32, #tpu.memory_space<vmem>>, vector<16x128xf32>
      %c0_12 = arith.constant 0 : index
      %c0_13 = arith.constant 0 : index
      %13 = vector.load %arg5[%c0_12, %c0_13] : memref<1x128xf32, #tpu.memory_space<vmem>>, vector<1x128xf32>
      %14 = vector.broadcast %13 : vector<1x128xf32> to vector<16x128xf32>
      %15 = arith.addf %12, %14 : vector<16x128xf32>
      %c0_14 = arith.constant 0 : index
      %c0_15 = arith.constant 0 : index
      %16 = vector.load %arg6[%c0_14, %c0_15] : memref<16x128xf32, #tpu.memory_space<vmem>>, vector<16x128xf32>
      tpu.vector_store %arg6[%c0_14, %c0_15], %15 {strides = array<i32>} : memref<16x128xf32, #tpu.memory_space<vmem>>, vector<16x128xf32>,
    } else {
    }
    return
  }
  func.func @transform_0(%arg0: i32, %arg1: i32, %arg2: i32) -> (i32, i32) {
    %c0_i32 = arith.constant 0 : i32
    return %arg0, %arg2 : i32, i32
  }
  func.func @transform_1(%arg0: i32, %arg1: i32, %arg2: i32) -> (i32, i32) {
    %c0_i32 = arith.constant 0 : i32
    return %arg2, %arg1 : i32, i32
  }
  func.func @transform_2(%arg0: i32, %arg1: i32, %arg2: i32) -> (i32, i32) {
    %c0_i32 = arith.constant 0 : i32
    %c0_i32_0 = arith.constant 0 : i32
    return %c0_i32, %arg1 : i32, i32
  }
  func.func @transform_3(%arg0: i32, %arg1: i32, %arg2: i32) -> (i32, i32) {
    %c0_i32 = arith.constant 0 : i32
    return %arg0, %arg1 : i32, i32
  }
}

</mosaic_0001>

<bundles_post_ra>
// kernel: transformer_comment_gen.32
= control target key start
LH: loop header
LB: loop body
LE: loop exit
PB: predicated region body
PF: predicated region fallthrough
CT: control target
= control target key end

     0   :  { %s788_s12 = smov 0   ;;  %s790_s13 = smov 0   ;;  %s852_s0 = inlined_call_operand.vmem [shape: bf16[8,16,32], index: 0, kind: input, shape index: {}]   ;;  %s853_s1 = inlined_call_operand.vmem [shape: bf16[8,16,32], index: 1, kind: input, shape index: {}]   ;;  %s854_s2 = inlined_call_operand.vmem [shape: bf16[8,16,32], index: 2, kind: input, shape index: {}]   ;;  %s855_s3 = inlined_call_operand.vmem [shape: bf16[8,16,32], index: 3, kind: output, shape index: {}]  }
   0x1   :  { %s792_s14 = smov 0  }
   0x2 LB: > { %s32_s15 = sadd.s32 1, %s758_s13  ;;  %p655_p0 = scmp.ge.s32.totalorder %s762_s14, 1  ;;  %s762_s14 = sphi %s792_s14, %s13_s14   ;;  %s758_s13 = sphi %s790_s13, %s857_s13   ;;  %s754_s12 = sphi %s788_s12, %s856_s12  }
   0x3   : > { %p34_p1 = scmp.ge.s32.totalorder %s32_s15, 8  ;;  %p199_p2 = scmp.lt.s32.totalorder %s762_s14, 9 }
   0x5   : > { %s859_s15 = smov (%p34_p1, %s32_s15), 0  ;;  %p200_p3 = pnand %p655_p0, %p199_p2 }
   0x6   : > { %p250_p4 = scmp.lt.s32.totalorder (!%p200_p3), %s754_s12, 7  ;;  %vm299_vm0 = vcmask (!%p200_p3), 261120   ;;  %v764_v0 = vmov (!%p200_p3), 0.0   ;;  %vm765_vm1 = vmmov (!%p200_p3), 0   ;;  %vm294_vm2 = vcmask (!%p200_p3), 7168  }
   0x7   : > { %203 = sbr.rel (%p200_p3) target bundleno = 828 (0x33c), region = 32  ;;  %683 = vmatprep.subr.bf16.mxu0 (!%p200_p3), %v764_v0  ;;  %300 = vst.msk [vmem:[#allocation4] sm:$0xff] (!%p200_p3), %vm299_vm0, %v764_v0  ;;  %301 = vst.msk [vmem:[#allocation4 + $0x8] sm:$0xff] (!%p200_p3), %vm299_vm0, %v764_v0  ;;  %685 = vmatprep.mubr.msk.bf16.mxu0 (!%p200_p3), %vm765_vm1, %v764_v0  ;;  %v766_v4 = vmov (!%p200_p3), -1e+30   ;;  %v365_v5 = vlaneseq (!%p200_p3)  ;;  %vm374_vm4 = vcmask (!%p200_p3), 130048  }
   0x8   : > { %689 = vmatprep.subr.bf16.mxu1 (!%p200_p3), %v764_v0  ;;  %691 = vmatprep.mubr.msk.bf16.mxu1 (!%p200_p3), %vm765_vm1, %v764_v0  ;;  %295 = vst.msk [vmem:[#allocation2] sm:$0xff] (!%p200_p3), %vm294_vm2, %v766_v4  ;;  %296 = vst.msk [vmem:[#allocation2 + $0x8] sm:$0xff] (!%p200_p3), %vm294_vm2, %v766_v4  ;;  %v767_v15 = vmov (!%p200_p3), 0   ;;  %vm522_vm5 = vcmask (!%p200_p3), 257024  }
   0x9   : > { %297 = vst.msk [vmem:[#allocation3] sm:$0xff] (!%p200_p3), %vm294_vm2, %v764_v0  ;;  %298 = vst.msk [vmem:[#allocation3 + $0x8] sm:$0xff] (!%p200_p3), %vm294_vm2, %v764_v0  ;;  %v366_v6 = vand.u32 (!%p200_p3), 127, %v365_v5  ;;  %723 = vset.pattern.permute.xlu1 (!%p200_p3), %v767_v15  ;;  %724 = vset.pattern.permute.xlu0 (!%p200_p3), %v767_v15 }
   0xb   : > { %vm369_vm3 = vcmp.ge.s32.totalorder (!%p200_p3), %v366_v6, 8 }
   0xe   : > { %s861_s12 = smov (!%p250_p4, %s754_s12), 7  ;;  %v420_v52 = vld [vmem:[#allocation4] sm:$0xff]  ;;  %v421_v54 = vld [vmem:[#allocation4 + $0x8] sm:$0xff] }
   0xf   : > { %s808_s16 = sshll.u32 %s861_s12, 3  ;;  %v372_v16 = vld [vmem:[#allocation2] sm:$0xff]  ;;  %v373_v19 = vld [vmem:[#allocation2 + $0x8] sm:$0xff] }
  0x10   : > { %s267_s19 = scalar_lea.vmem %s853_s1, %s808_s16  ;;  %s257_s22 = scalar_lea.vmem %s852_s0, %s808_s16  ;;  %v405_v40 = vld [vmem:[#allocation3] sm:$0xff]  ;;  %v406_v43 = vld [vmem:[#allocation3 + $0x8] sm:$0xff] }
  0x11   : > { %v725_v1 = vld [vmem:[%s267_s19] sm:$0xff]   ;;  %s277_s25 = scalar_lea.vmem %s854_s2, %s808_s16  ;;  %s287_s28 = scalar_lea.vmem %s855_s3, %s808_s16 }
  0x12   : > { %v321_v2 = vsel %vm299_vm0, %v725_v1, 0  ;;  %v726_v3 = vld [vmem:[%s257_s22] sm:$0xff]  }
  0x13   : > { %684 = vmatpush3.bf16.xpose.msra.mxu0 %v321_v2  ;;  %v727_v24 = vld [vmem:[%s277_s25] sm:$0xff]  }
  0x14   : > { %690 = vmatpush3.bf16.msra.mxu1 %v727_v24 }
  0x1a   : > { %686 = vmatmul.mubr.msk.bf16.vlgmr.msra.gmra.mrb[0].mxu0 %vm299_vm0, %v726_v3 }
  0xed   : > { %v357_v7 = vpop.f32.mrb[0].mxu0 }
  0xee   : > { %v370_v8 = vsel %vm369_vm3, -1e+30, %v357_v7  ;;  %v687_v9 = vpop.f32.mrb[1].mxu0 }
  0xef   : > { %v360_v10 = vpop.f32.mrb[2].mxu0  ;;  %v375_v11 = vsel %vm374_vm4, %v370_v8, -inf }
  0xf0   : > { %v371_v12 = vsel %vm369_vm3, -1e+30, %v360_v10  ;;  %376 = vmax.xlane.f32.xlu0 %v375_v11  ;;  %v688_v13 = vpop.f32.mrb[3].mxu0 }
  0xf1   : > { %v378_v14 = vsel %vm374_vm4, %v371_v12, -inf }
  0xf4   : > { %379 = vmax.xlane.f32.xlu0 %v378_v14 }
 0x17d   : > { %v377_v17 = vpop.xlane.xlu0 %376 }
 0x17e   : > { %v381_v18 = vmax.f32 %v372_v16, %v377_v17 }
 0x180   : > { %v383_v20 = vsub.f32 %v372_v16, %v381_v18  ;;  %491 = vst.msk [vmem:[#allocation2] sm:$0xff] %vm294_vm2, %v381_v18  ;;  %391 = vperm.xlu1 %723, %v381_v18  }
 0x181   : > { %v380_v21 = vpop.xlane.xlu0 %379 }
 0x182   : > { %v382_v22 = vmax.f32 %v373_v19, %v380_v21  ;;  %v385_v37 = vmul.f32 1.442695, %v383_v20 }
 0x184   : > { %v384_v23 = vsub.f32 %v373_v19, %v382_v22  ;;  %492 = vst.msk [vmem:[#allocation2 + $0x8] sm:$0xff] %vm294_vm2, %v382_v22  ;;  %396 = vperm.xlu1 %723, %v382_v22  }
 0x186   : > { %v387_v36 = vmul.f32 1.442695, %v384_v23 }
 0x1ff   : > { %v392_v25 = vpop.permute.xlu1 %391 }
 0x200   : > { %v399_v26 = vsub.f32 %v370_v8, %v392_v25 }
 0x202   : > { %v401_v27 = vmul.f32 1.442695, %v399_v26 }
 0x203   : > { %v397_v28 = vpop.permute.xlu1 %396 }
 0x204   : > { %728 = vpow2.f32 %v401_v27  ;;  %v400_v29 = vsub.f32 %v371_v12, %v397_v28 }
 0x206   : > { %v403_v30 = vmul.f32 1.442695, %v400_v29 }
 0x208   : > { %730 = vpow2.f32 %v403_v30 }
 0x209   : > { %732 = vpow2.f32 %v387_v36 }
 0x20a   : > { %734 = vpow2.f32 %v385_v37 }
 0x20e   : > { %v729_v31 = vpop.eup %728 }
 0x20f   : > { %v409_v32 = vsel %vm374_vm4, %v729_v31, 0.0 }
 0x210   : > { %410 = vadd.xlane.f32.xlu0 %v409_v32 }
 0x212   : > { %v731_v33 = vpop.eup %730 }
 0x213   : > { %v412_v34 = vsel %vm374_vm4, %v731_v33, 0.0  ;;  %v434_v35 = vpack.c.bf16 %v731_v33, %v729_v31  ;;  %v733_v38 = vpop.eup %732 }
 0x214   : > { %413 = vadd.xlane.f32.xlu1 %v412_v34  ;;  %v735_v39 = vpop.eup %734  ;;  %v408_v45 = vmul.f32 %v733_v38, %v406_v43 }
 0x215   : > { %692 = vmatmul.mubr.msk.bf16.vlgmr.msra.gmra.mrb[0].mxu1 %vm374_vm4, %v434_v35  ;;  %v407_v41 = vmul.f32 %v735_v39, %v405_v40 }
 0x225   : > { %429 = vperm.xlu1 %723, %v733_v38  }
 0x226   : > { %424 = vperm.xlu0 %724, %v735_v39  }
 0x29d   : > { %v411_v42 = vpop.xlane.xlu0 %410 }
 0x29e   : > { %v415_v44 = vadd.f32 %v411_v42, %v407_v41 }
 0x2a0   : > { %418 = vst.msk [vmem:[#allocation3] sm:$0xff] %vm294_vm2, %v415_v44 }
 0x2a1   : > { %v414_v46 = vpop.xlane.xlu1 %413 }
 0x2a2   : > { %v416_v47 = vadd.f32 %v414_v46, %v408_v45 }
 0x2a4   : > { %419 = vst.msk [vmem:[#allocation3 + $0x8] sm:$0xff] %vm294_vm2, %v416_v47 }
 0x2a5   : > { %v425_v53 = vpop.permute.xlu0 %424  ;;  %v430_v55 = vpop.permute.xlu1 %429 }
 0x2a6   : > { %v432_v56 = vmul.f32 %v425_v53, %v420_v52  ;;  %v433_v58 = vmul.f32 %v430_v55, %v421_v54 }
 0x2a7   : > { %v496_v48 = vld [vmem:[#allocation3] sm:$0xff] }
 0x2a8   : > { %736 = vrcp.f32 %v496_v48 }
 0x2ab   : > { %v497_v49 = vld [vmem:[#allocation3 + $0x8] sm:$0xff] }
 0x2ac   : > { %738 = vrcp.f32 %v497_v49 }
 0x2b2   : > { %v737_v50 = vpop.eup %736 }
 0x2b3   : > { %504 = vperm.xlu0 %724, %v737_v50  }
 0x2b6   : > { %v739_v51 = vpop.eup %738 }
 0x2b7   : > { %509 = vperm.xlu0 %724, %v739_v51  }
 0x2e8   : > { %v480_v57 = vpop.f32.mrb[0].mxu1 }
 0x2e9   : > { %v487_v59 = vadd.f32 %v480_v57, %v432_v56  ;;  %v693_v60 = vpop.f32.mrb[1].mxu1 }
 0x2ea   : > { %v483_v61 = vpop.f32.mrb[2].mxu1 }
 0x2eb   : > { %489 = vst.msk [vmem:[#allocation4] sm:$0xff] %vm299_vm0, %v487_v59  ;;  %v488_v62 = vadd.f32 %v483_v61, %v433_v58  ;;  %v694_v63 = vpop.f32.mrb[3].mxu1 }
 0x2ed   : > { %490 = vst.msk [vmem:[#allocation4 + $0x8] sm:$0xff] %vm299_vm0, %v488_v62 }
 0x2f2   : > { %v500_v0 = vld [vmem:[#allocation4] sm:$0xff] }
 0x2f4   : > { %v501_v4 = vld [vmem:[#allocation4 + $0x8] sm:$0xff] }
 0x332   : > { %v505_v1 = vpop.permute.xlu0 %504 }
 0x333   : > { %v512_v2 = vmul.f32 %v505_v1, %v500_v0 }
 0x335   : > { %v677_v3 = vpack.c.bf16 %v512_v2, %v512_v2 }
 0x336   : > { %v510_v5 = vpop.permute.xlu0 %509 }
 0x337   : > { %523 = vst.msk [vmem:[%s287_s28] sm:$0xf] %vm522_vm5, %v677_v3  ;;  %v513_v6 = vmul.f32 %v510_v5, %v501_v4 }
 0x339   : > { %v678_v7 = vpack.c.bf16 %v513_v6, %v513_v6 }
 0x33b   : > { %524 = vst.msk [vmem:[%s287_s28 + $0x4] sm:$0xf] %vm522_vm5, %v678_v7 }
 0x33c PF: > { %s13_s14 = sadd.s32 1, %s762_s14   ;;  %s856_s12 = smov %s758_s13 }
 0x33d   : > { %p10_p5 = scmp.ge.s32.totalorder %s13_s14, 10   ;;  %s857_s13 = smov %s859_s15 }
 0x33f   :  { %12 = sbr.rel (!%p10_p5) target bundleno = 2 (0x2), region = 76 }

// kernel: transformer_comment_gen.31
= control target key start
LH: loop header
LB: loop body
LE: loop exit
PB: predicated region body
PF: predicated region fallthrough
CT: control target
= control target key end

     0   :  { %v453_v0 = vmov 0.0   ;;  %vm454_vm0 = vmmov 0   ;;  %v455_v3 = vmov 0   ;;  %v306_v27 = vlaneseq  ;;  %s566_s1 = inlined_call_operand.vmem [shape: bf16[128,384], index: 1, kind: input, shape index: {}]   ;;  %s567_s0 = inlined_call_operand.vmem [shape: bf16[16,128], index: 0, kind: input, shape index: {}]   ;;  %s568_s2 = inlined_call_operand.vmem [shape: f32[1,384], index: 2, kind: input, shape index: {}]   ;;  %s569_s3 = inlined_call_operand.vmem [shape: bf16[16,384], index: 3, kind: output, shape index: {}]  }
   0x1   :  { %397 = vmatprep.subr.bf16.mxu1 %v453_v0  ;;  %v420_v1 = vld [vmem:[%s566_s1 + $0x4] ss:$12 sps:$4 sm:$0xff]   ;;  %413 = vmatprep.mubr.msk.bf16.mxu1 %vm454_vm0, %v453_v0  ;;  %v422_v2 = vld [vmem:[%s566_s1 + $0x8] ss:$12 sps:$4 sm:$0xff]   ;;  %v423_v4 = vld [vmem:[%s566_s1] ss:$12 sps:$4 sm:$0xff]  }
   0x2   :  { %231 = vmatprep.mubr.bf16.mxu0 %v455_v3  ;;  %199 = vmatprep.subr.bf16.mxu0 %v420_v1  ;;  %v424_v5 = vld [vmem:[%s566_s1 + $0x1c] ss:$12 sps:$4 sm:$0xff]   ;;  %v426_v6 = vld [vmem:[%s566_s1 + $0x20] ss:$12 sps:$4 sm:$0xff]   ;;  %v427_v7 = vld [vmem:[%s566_s1 + $0x18] ss:$12 sps:$4 sm:$0xff]  }
   0x3   :  { %398 = vmatpush3.bf16.msra.mxu1 %v422_v2  ;;  %200 = vmatpush1.bf16.msra.mxu0 %v423_v4  ;;  %v428_v8 = vld [vmem:[%s566_s1 + $0x34] ss:$12 sps:$4 sm:$0xff]   ;;  %v430_v9 = vld [vmem:[%s566_s1 + $0x38] ss:$12 sps:$4 sm:$0xff]   ;;  %v431_v10 = vld [vmem:[%s566_s1 + $0x30] ss:$12 sps:$4 sm:$0xff]  }
   0x4   :  { %399 = vmatprep.subr.bf16.mxu1 %v453_v0  ;;  %201 = vmatprep.subr.bf16.mxu0 %v424_v5  ;;  %v432_v11 = vld [vmem:[%s566_s1 + $0x4c] ss:$12 sps:$4 sm:$0xff]   ;;  %v434_v12 = vld [vmem:[%s566_s1 + $0x50] ss:$12 sps:$4 sm:$0xff]   ;;  %v435_v13 = vld [vmem:[%s566_s1 + $0x48] ss:$12 sps:$4 sm:$0xff]  }
   0x5   :  { %v436_v14 = vld [vmem:[%s566_s1 + $0x64] ss:$12 sps:$4 sm:$0xff]   ;;  %v438_v15 = vld [vmem:[%s566_s1 + $0x68] ss:$12 sps:$4 sm:$0xff]   ;;  %v439_v16 = vld [vmem:[%s566_s1 + $0x60] ss:$12 sps:$4 sm:$0xff]  }
   0x6   :  { %v440_v17 = vld [vmem:[%s566_s1 + $0x7c] ss:$12 sps:$4 sm:$0xff]   ;;  %v442_v18 = vld [vmem:[%s566_s1 + $0x80] ss:$12 sps:$4 sm:$0xff]   ;;  %v443_v19 = vld [vmem:[%s566_s1 + $0x78] ss:$12 sps:$4 sm:$0xff]  }
   0x7   :  { %400 = vmatpush3.bf16.msra.mxu1 %v426_v6  ;;  %202 = vmatpush1.bf16.msra.mxu0 %v427_v7  ;;  %v444_v20 = vld [vmem:[%s566_s1 + $0x94] ss:$12 sps:$4 sm:$0xff]   ;;  %v446_v21 = vld [vmem:[%s566_s1 + $0x98] ss:$12 sps:$4 sm:$0xff]   ;;  %v447_v22 = vld [vmem:[%s566_s1 + $0x90] ss:$12 sps:$4 sm:$0xff]  }
   0x8   :  { %401 = vmatprep.subr.bf16.mxu1 %v453_v0  ;;  %203 = vmatprep.subr.bf16.mxu0 %v428_v8  ;;  %v448_v23 = vld [vmem:[%s566_s1 + $0xac] ss:$12 sps:$4 sm:$0xff]   ;;  %v450_v24 = vld [vmem:[%s566_s1 + $0xb0] ss:$12 sps:$4 sm:$0xff]   ;;  %v451_v25 = vld [vmem:[%s566_s1 + $0xa8] ss:$12 sps:$4 sm:$0xff]  }
   0x9   :  { %v452_v26 = vld [vmem:[%s567_s0] sm:$0xff]   ;;  %v307_v28 = vshrl.u32 %v306_v27, 7 }
   0xa   :  { %v304_v30 = vld [vmem:[%s568_s2] sm:$0x7] }
   0xb   :  { %402 = vmatpush3.bf16.msra.mxu1 %v430_v9  ;;  %204 = vmatpush1.bf16.msra.mxu0 %v431_v10  ;;  %v316_v29 = vsub.s32 2, %v307_v28  ;;  %v308_v31 = vsub.s32 0, %v307_v28  ;;  %v312_v32 = vsub.s32 1, %v307_v28 }
   0xc   :  { %403 = vmatprep.subr.bf16.mxu1 %v453_v0  ;;  %205 = vmatprep.subr.bf16.mxu0 %v432_v11 }
   0xd   :  { %v317_v33 = vrot.slane %v304_v30, %v316_v29  ;;  %v309_v34 = vrot.slane %v304_v30, %v308_v31  ;;  %v313_v35 = vrot.slane %v304_v30, %v312_v32 }
   0xf   :  { %404 = vmatpush3.bf16.msra.mxu1 %v434_v12  ;;  %206 = vmatpush1.bf16.msra.mxu0 %v435_v13 }
  0x10   :  { %405 = vmatprep.subr.bf16.mxu1 %v453_v0  ;;  %207 = vmatprep.subr.bf16.mxu0 %v436_v14 }
  0x13   :  { %406 = vmatpush3.bf16.msra.mxu1 %v438_v15  ;;  %208 = vmatpush1.bf16.msra.mxu0 %v439_v16 }
  0x14   :  { %407 = vmatprep.subr.bf16.mxu1 %v453_v0  ;;  %209 = vmatprep.subr.bf16.mxu0 %v440_v17 }
  0x17   :  { %408 = vmatpush3.bf16.msra.mxu1 %v442_v18  ;;  %210 = vmatpush1.bf16.msra.mxu0 %v443_v19 }
  0x18   :  { %409 = vmatprep.subr.bf16.mxu1 %v453_v0  ;;  %211 = vmatprep.subr.bf16.mxu0 %v444_v20 }
  0x1b   :  { %410 = vmatpush3.bf16.msra.mxu1 %v446_v21  ;;  %212 = vmatpush1.bf16.msra.mxu0 %v447_v22 }
  0x1c   :  { %411 = vmatprep.subr.bf16.mxu1 %v453_v0  ;;  %213 = vmatprep.subr.bf16.mxu0 %v448_v23 }
  0x1f   :  { %412 = vmatpush3.bf16.msra.mxu1 %v450_v24  ;;  %214 = vmatpush1.bf16.msra.mxu0 %v451_v25 }
  0x22   :  { %414 = vmatmul.mubr.bf16.vlgmr.msra.gmra.mrb[0].mxu1 %v452_v26  ;;  %232 = vmatmul.mubr.bf16.vlgmr.msra.gmra.mrb[0].mxu0 %v452_v26 }
  0xf5   :  { %v276_v36 = vpop.f32.mrb[0].mxu1  ;;  %v233_v38 = vpop.f32.mrb[0].mxu0 }
  0xf6   :  { %v323_v37 = vadd.f32 %v317_v33, %v276_v36  ;;  %v415_v39 = vpop.f32.mrb[1].mxu1  ;;  %v321_v40 = vadd.f32 %v309_v34, %v233_v38  ;;  %v235_v41 = vpop.f32.mrb[1].mxu0 }
  0xf7   :  { %v279_v42 = vpop.f32.mrb[2].mxu1  ;;  %v322_v44 = vadd.f32 %v313_v35, %v235_v41  ;;  %v237_v46 = vpop.f32.mrb[2].mxu0 }
  0xf8   :  { %v385_v43 = vpack.c.bf16 %v323_v37, %v323_v37  ;;  %v326_v45 = vadd.f32 %v317_v33, %v279_v42  ;;  %v416_v47 = vpop.f32.mrb[3].mxu1  ;;  %v324_v48 = vadd.f32 %v309_v34, %v237_v46  ;;  %v239_v49 = vpop.f32.mrb[3].mxu0 }
  0xf9   :  { %v384_v50 = vpack.c.bf16 %v322_v44, %v321_v40  ;;  %v325_v52 = vadd.f32 %v313_v35, %v239_v49 }
  0xfa   :  { %348 = vst [vmem:[%s569_s3 + $0x8] sm:$0xf] %v385_v43  ;;  %v387_v51 = vpack.c.bf16 %v326_v45, %v326_v45 }
  0xfb   :  { %347 = vst [vmem:[%s569_s3] sm:$0xff] %v384_v50  ;;  %v386_v53 = vpack.c.bf16 %v325_v52, %v324_v48 }
  0xfc   :  { %350 = vst [vmem:[%s569_s3 + $0x14] sm:$0xf] %v387_v51 }
  0xfd   :  { %349 = vst [vmem:[%s569_s3 + $0xc] sm:$0xff] %v386_v53 }

// kernel: transformer_comment_gen.33
= control target key start
LH: loop header
LB: loop body
LE: loop exit
PB: predicated region body
PF: predicated region fallthrough
CT: control target
= control target key end

     0   :  { %v293_v0 = vmov 0.0   ;;  %vm294_vm0 = vmmov 0   ;;  %s372_s1 = inlined_call_operand.vmem [shape: bf16[128,128], index: 1, kind: input, shape index: {}]   ;;  %s373_s0 = inlined_call_operand.vmem [shape: bf16[16,128], index: 0, kind: input, shape index: {}]   ;;  %s374_s3 = inlined_call_operand.vmem [shape: bf16[16,128], index: 3, kind: input, shape index: {}]   ;;  %s375_s2 = inlined_call_operand.vmem [shape: f32[1,128], index: 2, kind: input, shape index: {}]   ;;  %s376_s4 = inlined_call_operand.vmem [shape: f32[1,128], index: 4, kind: input, shape index: {}]   ;;  %s377_s5 = inlined_call_operand.vmem [shape: f32[1,128], index: 5, kind: input, shape index: {}]   ;;  %s378_s6 = inlined_call_operand.vmem [shape: bf16[16,128], index: 6, kind: output, shape index: {}]  }
   0x1   :  { %258 = vmatprep.subr.bf16.mxu0 %v293_v0  ;;  %v280_v1 = vld [vmem:[%s372_s1] sm:$0xff]   ;;  %274 = vmatprep.mubr.msk.bf16.mxu0 %vm294_vm0, %v293_v0  ;;  %v281_v2 = vld [vmem:[%s372_s1 + $0x8] sm:$0xff]   ;;  %v282_v3 = vld [vmem:[%s372_s1 + $0x10] sm:$0xff]  }
   0x2   :  { %259 = vmatpush3.bf16.msra.mxu0 %v280_v1  ;;  %v283_v4 = vld [vmem:[%s372_s1 + $0x18] sm:$0xff]   ;;  %v284_v5 = vld [vmem:[%s372_s1 + $0x20] sm:$0xff]   ;;  %v285_v6 = vld [vmem:[%s372_s1 + $0x28] sm:$0xff]  }
   0x3   :  { %260 = vmatprep.subr.bf16.mxu0 %v293_v0  ;;  %v286_v7 = vld [vmem:[%s372_s1 + $0x30] sm:$0xff]   ;;  %v287_v8 = vld [vmem:[%s372_s1 + $0x38] sm:$0xff]   ;;  %v288_v9 = vld [vmem:[%s373_s0] sm:$0xff]  }
   0x4   :  { %v241_v10 = vld [vmem:[%s374_s3] sm:$0xff]  }
   0x5   :  { %v233_v11 = vld [vmem:[%s375_s2] ss:$0 sm:$0xff]  ;;  %v242_v12 = vunpack.c.l.bf16 %v241_v10  ;;  %v243_v20 = vunpack.c.h.bf16 %v241_v10 }
   0x6   :  { %261 = vmatpush3.bf16.msra.mxu0 %v281_v2  ;;  %v234_v38 = vld [vmem:[%s376_s4] ss:$0 sm:$0xff] }
   0x7   :  { %262 = vmatprep.subr.bf16.mxu0 %v293_v0  ;;  %v235_v42 = vld [vmem:[%s377_s5] ss:$0 sm:$0xff] }
   0xa   :  { %263 = vmatpush3.bf16.msra.mxu0 %v282_v3 }
   0xb   :  { %264 = vmatprep.subr.bf16.mxu0 %v293_v0 }
   0xe   :  { %265 = vmatpush3.bf16.msra.mxu0 %v283_v4 }
   0xf   :  { %266 = vmatprep.subr.bf16.mxu0 %v293_v0 }
  0x12   :  { %267 = vmatpush3.bf16.msra.mxu0 %v284_v5 }
  0x13   :  { %268 = vmatprep.subr.bf16.mxu0 %v293_v0 }
  0x16   :  { %269 = vmatpush3.bf16.msra.mxu0 %v285_v6 }
  0x17   :  { %270 = vmatprep.subr.bf16.mxu0 %v293_v0 }
  0x1a   :  { %271 = vmatpush3.bf16.msra.mxu0 %v286_v7 }
  0x1b   :  { %272 = vmatprep.subr.bf16.mxu0 %v293_v0 }
  0x1e   :  { %273 = vmatpush3.bf16.msra.mxu0 %v287_v8 }
  0x21   :  { %275 = vmatmul.mubr.bf16.vlgmr.msra.gmra.mrb[0].mxu0 %v288_v9 }
  0xf4   :  { %v138_v13 = vpop.f32.mrb[0].mxu0 }
  0xf5   :  { %v161_v14 = vadd.f32 %v233_v11, %v138_v13  ;;  %v276_v15 = vpop.f32.mrb[1].mxu0 }
  0xf6   :  { %v141_v16 = vpop.f32.mrb[2].mxu0 }
  0xf7   :  { %v162_v17 = vadd.f32 %v233_v11, %v141_v16  ;;  %v277_v18 = vpop.f32.mrb[3].mxu0  ;;  %v167_v19 = vadd.f32 %v242_v12, %v161_v14 }
  0xf9   :  { %169 = vadd.xlane.f32.xlu0 %v167_v19  ;;  %v168_v21 = vadd.f32 %v243_v20, %v162_v17 }
  0xfd   :  { %171 = vadd.xlane.f32.xlu0 %v168_v21 }
 0x186   :  { %v170_v22 = vpop.xlane.xlu0 %169 }
 0x187   :  { %v174_v23 = vmul.f32 0.0078125, %v170_v22 }
 0x189   :  { %v176_v24 = vsub.f32 %v167_v19, %v174_v23 }
 0x18a   :  { %v172_v25 = vpop.xlane.xlu0 %171 }
 0x18b   :  { %v175_v26 = vmul.f32 0.0078125, %v172_v25  ;;  %v178_v27 = vmul.f32 %v176_v24, %v176_v24 }
 0x18d   :  { %v177_v28 = vsub.f32 %v168_v21, %v175_v26  ;;  %180 = vadd.xlane.f32.xlu1 %v178_v27 }
 0x18f   :  { %v179_v29 = vmul.f32 %v177_v28, %v177_v28 }
 0x191   :  { %182 = vadd.xlane.f32.xlu1 %v179_v29 }
 0x21a   :  { %v181_v30 = vpop.xlane.xlu1 %180 }
 0x21b   :  { %v184_v31 = vmul.f32 0.0078125, %v181_v30 }
 0x21d   :  { %v186_v32 = vadd.f32 1e-05, %v184_v31 }
 0x21e   :  { %v183_v33 = vpop.xlane.xlu1 %182 }
 0x21f   :  { %289 = vrsqrt.f32 %v186_v32  ;;  %v185_v34 = vmul.f32 0.0078125, %v183_v33 }
 0x221   :  { %v187_v35 = vadd.f32 1e-05, %v185_v34 }
 0x223   :  { %291 = vrsqrt.f32 %v187_v35 }
 0x229   :  { %v290_v36 = vpop.eup %289 }
 0x22a   :  { %v190_v37 = vmul.f32 %v290_v36, %v176_v24 }
 0x22c   :  { %v199_v40 = vmul.f32 %v234_v38, %v190_v37 }
 0x22d   :  { %v292_v39 = vpop.eup %291 }
 0x22e   :  { %v191_v41 = vmul.f32 %v292_v39, %v177_v28  ;;  %v208_v44 = vadd.f32 %v235_v42, %v199_v40 }
 0x230   :  { %v200_v43 = vmul.f32 %v234_v38, %v191_v41 }
 0x232   :  { %v209_v45 = vadd.f32 %v235_v42, %v200_v43 }
 0x234   :  { %v247_v46 = vpack.c.bf16 %v209_v45, %v208_v44 }
 0x236   :  { %248 = vst [vmem:[%s378_s6] sm:$0xff] %v247_v46  }

// kernel: transformer_comment_gen.34
= control target key start
LH: loop header
LB: loop body
LE: loop exit
PB: predicated region body
PF: predicated region fallthrough
CT: control target
= control target key end

     0   :  { %v274_v1 = vmov 0   ;;  %v191_v18 = vlaneseq  ;;  %s355_s1 = inlined_call_operand.vmem [shape: bf16[128,256], index: 1, kind: input, shape index: {}]   ;;  %s356_s0 = inlined_call_operand.vmem [shape: bf16[16,128], index: 0, kind: input, shape index: {}]   ;;  %s357_s2 = inlined_call_operand.vmem [shape: f32[1,256], index: 2, kind: input, shape index: {}]   ;;  %s358_s3 = inlined_call_operand.vmem [shape: bf16[16,256], index: 3, kind: output, shape index: {}]  }
   0x1   :  { %v249_v0 = vld [vmem:[%s355_s1 + $0x4] ss:$8 sps:$4 sm:$0xff]   ;;  %163 = vmatprep.mubr.bf16.mxu0 %v274_v1  ;;  %v251_v2 = vld [vmem:[%s355_s1] ss:$8 sps:$4 sm:$0xff]   ;;  %v252_v3 = vld [vmem:[%s355_s1 + $0x14] ss:$8 sps:$4 sm:$0xff]  }
   0x2   :  { %131 = vmatprep.subr.bf16.mxu0 %v249_v0  ;;  %v254_v4 = vld [vmem:[%s355_s1 + $0x10] ss:$8 sps:$4 sm:$0xff]   ;;  %v255_v5 = vld [vmem:[%s355_s1 + $0x24] ss:$8 sps:$4 sm:$0xff]   ;;  %v257_v6 = vld [vmem:[%s355_s1 + $0x20] ss:$8 sps:$4 sm:$0xff]  }
   0x3   :  { %132 = vmatpush1.bf16.msra.mxu0 %v251_v2  ;;  %v258_v7 = vld [vmem:[%s355_s1 + $0x34] ss:$8 sps:$4 sm:$0xff]   ;;  %v260_v8 = vld [vmem:[%s355_s1 + $0x30] ss:$8 sps:$4 sm:$0xff]   ;;  %v261_v9 = vld [vmem:[%s355_s1 + $0x44] ss:$8 sps:$4 sm:$0xff]  }
   0x4   :  { %133 = vmatprep.subr.bf16.mxu0 %v252_v3  ;;  %v263_v10 = vld [vmem:[%s355_s1 + $0x40] ss:$8 sps:$4 sm:$0xff]   ;;  %v264_v11 = vld [vmem:[%s355_s1 + $0x54] ss:$8 sps:$4 sm:$0xff]   ;;  %v266_v12 = vld [vmem:[%s355_s1 + $0x50] ss:$8 sps:$4 sm:$0xff]  }
   0x5   :  { %v267_v13 = vld [vmem:[%s355_s1 + $0x64] ss:$8 sps:$4 sm:$0xff]   ;;  %v269_v14 = vld [vmem:[%s355_s1 + $0x60] ss:$8 sps:$4 sm:$0xff]   ;;  %v270_v15 = vld [vmem:[%s355_s1 + $0x74] ss:$8 sps:$4 sm:$0xff]  }
   0x6   :  { %v272_v16 = vld [vmem:[%s355_s1 + $0x70] ss:$8 sps:$4 sm:$0xff]   ;;  %v273_v17 = vld [vmem:[%s356_s0] sm:$0xff]   ;;  %v192_v19 = vshrl.u32 %v191_v18, 7 }
   0x7   :  { %134 = vmatpush1.bf16.msra.mxu0 %v254_v4  ;;  %v189_v21 = vld [vmem:[%s357_s2] sm:$0x3] }
   0x8   :  { %135 = vmatprep.subr.bf16.mxu0 %v255_v5  ;;  %v193_v20 = vsub.s32 0, %v192_v19  ;;  %v197_v22 = vsub.s32 1, %v192_v19 }
   0xa   :  { %v194_v23 = vrot.slane %v189_v21, %v193_v20  ;;  %v198_v24 = vrot.slane %v189_v21, %v197_v22 }
   0xb   :  { %136 = vmatpush1.bf16.msra.mxu0 %v257_v6 }
   0xc   :  { %137 = vmatprep.subr.bf16.mxu0 %v258_v7 }
   0xf   :  { %138 = vmatpush1.bf16.msra.mxu0 %v260_v8 }
  0x10   :  { %139 = vmatprep.subr.bf16.mxu0 %v261_v9 }
  0x13   :  { %140 = vmatpush1.bf16.msra.mxu0 %v263_v10 }
  0x14   :  { %141 = vmatprep.subr.bf16.mxu0 %v264_v11 }
  0x17   :  { %142 = vmatpush1.bf16.msra.mxu0 %v266_v12 }
  0x18   :  { %143 = vmatprep.subr.bf16.mxu0 %v267_v13 }
  0x1b   :  { %144 = vmatpush1.bf16.msra.mxu0 %v269_v14 }
  0x1c   :  { %145 = vmatprep.subr.bf16.mxu0 %v270_v15 }
  0x1f   :  { %146 = vmatpush1.bf16.msra.mxu0 %v272_v16 }
  0x22   :  { %164 = vmatmul.mubr.bf16.vlgmr.msra.gmra.mrb[0].mxu0 %v273_v17 }
  0xf5   :  { %v165_v25 = vpop.f32.mrb[0].mxu0 }
  0xf6   :  { %v201_v26 = vadd.f32 %v194_v23, %v165_v25  ;;  %v167_v27 = vpop.f32.mrb[1].mxu0 }
  0xf7   :  { %v202_v28 = vadd.f32 %v198_v24, %v167_v27  ;;  %v169_v29 = vpop.f32.mrb[2].mxu0 }
  0xf8   :  { %v205_v30 = vmax.f32 %v201_v26, 0.0  ;;  %v203_v31 = vadd.f32 %v194_v23, %v169_v29  ;;  %v171_v32 = vpop.f32.mrb[3].mxu0 }
  0xf9   :  { %v206_v33 = vmax.f32 %v202_v28, 0.0  ;;  %v204_v34 = vadd.f32 %v198_v24, %v171_v32 }
  0xfa   :  { %v207_v35 = vmax.f32 %v203_v31, 0.0 }
  0xfb   :  { %v246_v36 = vpack.c.bf16 %v206_v33, %v205_v30  ;;  %v208_v37 = vmax.f32 %v204_v34, 0.0 }
  0xfd   :  { %221 = vst [vmem:[%s358_s3] sm:$0xff] %v246_v36  ;;  %v247_v38 = vpack.c.bf16 %v208_v37, %v207_v35 }
  0xff   :  { %222 = vst [vmem:[%s358_s3 + $0x8] sm:$0xff] %v247_v38 }

// kernel: transformer_comment_gen.41
= control target key start
LH: loop header
LB: loop body
LE: loop exit
PB: predicated region body
PF: predicated region fallthrough
CT: control target
= control target key end

     0   :  { %s124_s0 = inlined_call_operand.vmem [shape: bf16[16,128], index: 0, kind: input, shape index: {}]   ;;  %s125_s1 = inlined_call_operand.vmem [shape: f32[1,128], index: 1, kind: input, shape index: {}]   ;;  %s126_s2 = inlined_call_operand.vmem [shape: f32[1,128], index: 2, kind: input, shape index: {}]   ;;  %s127_s3 = inlined_call_operand.vmem [shape: bf16[16,128], index: 3, kind: output, shape index: {}]  }
   0x1   :  { %v80_v0 = vld [vmem:[%s124_s0] sm:$0xff]  }
   0x2   :  { %v81_v1 = vunpack.c.l.bf16 %v80_v0  ;;  %v82_v2 = vunpack.c.h.bf16 %v80_v0  ;;  %v73_v19 = vld [vmem:[%s125_s1] ss:$0 sm:$0xff] }
   0x3   :  { %v74_v23 = vld [vmem:[%s126_s2] ss:$0 sm:$0xff] }
   0x4   :  { %18 = vadd.xlane.f32.xlu0 %v81_v1 }
   0x8   :  { %20 = vadd.xlane.f32.xlu0 %v82_v2 }
  0x91   :  { %v19_v3 = vpop.xlane.xlu0 %18 }
  0x92   :  { %v23_v4 = vmul.f32 0.0078125, %v19_v3 }
  0x94   :  { %v25_v5 = vsub.f32 %v81_v1, %v23_v4 }
  0x95   :  { %v21_v6 = vpop.xlane.xlu0 %20 }
  0x96   :  { %v24_v7 = vmul.f32 0.0078125, %v21_v6  ;;  %v27_v8 = vmul.f32 %v25_v5, %v25_v5 }
  0x98   :  { %v26_v9 = vsub.f32 %v82_v2, %v24_v7  ;;  %29 = vadd.xlane.f32.xlu1 %v27_v8 }
  0x9a   :  { %v28_v10 = vmul.f32 %v26_v9, %v26_v9 }
  0x9c   :  { %31 = vadd.xlane.f32.xlu1 %v28_v10 }
 0x125   :  { %v30_v11 = vpop.xlane.xlu1 %29 }
 0x126   :  { %v33_v12 = vmul.f32 0.0078125, %v30_v11 }
 0x128   :  { %v35_v13 = vadd.f32 1e-05, %v33_v12 }
 0x129   :  { %v32_v14 = vpop.xlane.xlu1 %31 }
 0x12a   :  { %88 = vrsqrt.f32 %v35_v13  ;;  %v34_v15 = vmul.f32 0.0078125, %v32_v14 }
 0x12c   :  { %v36_v16 = vadd.f32 1e-05, %v34_v15 }
 0x12e   :  { %90 = vrsqrt.f32 %v36_v16 }
 0x134   :  { %v89_v17 = vpop.eup %88 }
 0x135   :  { %v39_v18 = vmul.f32 %v89_v17, %v25_v5 }
 0x137   :  { %v48_v21 = vmul.f32 %v73_v19, %v39_v18 }
 0x138   :  { %v91_v20 = vpop.eup %90 }
 0x139   :  { %v40_v22 = vmul.f32 %v91_v20, %v26_v9  ;;  %v57_v25 = vadd.f32 %v74_v23, %v48_v21 }
 0x13b   :  { %v49_v24 = vmul.f32 %v73_v19, %v40_v22 }
 0x13d   :  { %v58_v26 = vadd.f32 %v74_v23, %v49_v24 }
 0x13f   :  { %v86_v27 = vpack.c.bf16 %v58_v26, %v57_v25 }
 0x141   :  { %87 = vst [vmem:[%s127_s3] sm:$0xff] %v86_v27  }

// kernel: transformer_comment_gen.35
= control target key start
LH: loop header
LB: loop body
LE: loop exit
PB: predicated region body
PF: predicated region fallthrough
CT: control target
= control target key end

     0   :  { %s475_s1 = inlined_call_operand.vmem [shape: bf16[256,128], index: 1, kind: input, shape index: {}]   ;;  %s476_s0 = inlined_call_operand.vmem [shape: bf16[16,256], index: 0, kind: input, shape index: {}]   ;;  %s477_s3 = inlined_call_operand.vmem [shape: bf16[16,128], index: 3, kind: input, shape index: {}]   ;;  %s478_s2 = inlined_call_operand.vmem [shape: f32[1,128], index: 2, kind: input, shape index: {}]   ;;  %s479_s4 = inlined_call_operand.vmem [shape: f32[1,128], index: 4, kind: input, shape index: {}]   ;;  %s480_s5 = inlined_call_operand.vmem [shape: f32[1,128], index: 5, kind: input, shape index: {}]   ;;  %s481_s6 = inlined_call_operand.vmem [shape: bf16[16,128], index: 6, kind: output, shape index: {}]  }
   0x1   :  { %v348_v0 = vld [vmem:[%s475_s1 + $0x40] sm:$0xff]   ;;  %v350_v2 = vld [vmem:[%s475_s1 + $0x48] sm:$0xff]   ;;  %v352_v4 = vld [vmem:[%s475_s1 + $0x50] sm:$0xff]  }
   0x2   :  { %v349_v1 = vld [vmem:[%s475_s1] sm:$0xff]   ;;  %326 = vmatprep.subr.bf16.mxu0 %v348_v0  ;;  %v351_v3 = vld [vmem:[%s475_s1 + $0x8] sm:$0xff]   ;;  %v353_v5 = vld [vmem:[%s475_s1 + $0x10] sm:$0xff]  }
   0x3   :  { %327 = vmatpush3.bf16.msra.mxu0 %v349_v1  ;;  %v354_v6 = vld [vmem:[%s475_s1 + $0x58] sm:$0xff]   ;;  %v356_v8 = vld [vmem:[%s475_s1 + $0x60] sm:$0xff]   ;;  %v358_v10 = vld [vmem:[%s475_s1 + $0x68] sm:$0xff]  }
   0x4   :  { %328 = vmatprep.subr.bf16.mxu0 %v350_v2  ;;  %v355_v7 = vld [vmem:[%s475_s1 + $0x18] sm:$0xff]   ;;  %v357_v9 = vld [vmem:[%s475_s1 + $0x20] sm:$0xff]   ;;  %v359_v12 = vld [vmem:[%s475_s1 + $0x28] sm:$0xff]  }
   0x5   :  { %v366_v11 = vld [vmem:[%s476_s0 + $0x4] ss:$8 sps:$4 sm:$0xff]   ;;  %v360_v13 = vld [vmem:[%s475_s1 + $0x70] sm:$0xff]   ;;  %v362_v15 = vld [vmem:[%s475_s1 + $0x78] sm:$0xff]  }
   0x6   :  { %204 = vmatprep.mubr.bf16.mxu0 %v366_v11  ;;  %v361_v14 = vld [vmem:[%s475_s1 + $0x30] sm:$0xff]   ;;  %v363_v16 = vld [vmem:[%s475_s1 + $0x38] sm:$0xff]   ;;  %v364_v17 = vld [vmem:[%s476_s0] ss:$8 sps:$4 sm:$0xff]  }
   0x7   :  { %329 = vmatpush3.bf16.msra.mxu0 %v351_v3  ;;  %v318_v18 = vld [vmem:[%s477_s3] sm:$0xff]  }
   0x8   :  { %330 = vmatprep.subr.bf16.mxu0 %v352_v4  ;;  %v310_v21 = vld [vmem:[%s478_s2] ss:$0 sm:$0xff]  ;;  %v319_v24 = vunpack.c.l.bf16 %v318_v18  ;;  %v320_v30 = vunpack.c.h.bf16 %v318_v18 }
   0x9   :  { %v311_v48 = vld [vmem:[%s479_s4] ss:$0 sm:$0xff] }
   0xa   :  { %v312_v52 = vld [vmem:[%s480_s5] ss:$0 sm:$0xff] }
   0xb   :  { %331 = vmatpush3.bf16.msra.mxu0 %v353_v5 }
   0xc   :  { %332 = vmatprep.subr.bf16.mxu0 %v354_v6 }
   0xf   :  { %333 = vmatpush3.bf16.msra.mxu0 %v355_v7 }
  0x10   :  { %334 = vmatprep.subr.bf16.mxu0 %v356_v8 }
  0x13   :  { %335 = vmatpush3.bf16.msra.mxu0 %v357_v9 }
  0x14   :  { %336 = vmatprep.subr.bf16.mxu0 %v358_v10 }
  0x17   :  { %337 = vmatpush3.bf16.msra.mxu0 %v359_v12 }
  0x18   :  { %338 = vmatprep.subr.bf16.mxu0 %v360_v13 }
  0x1b   :  { %339 = vmatpush3.bf16.msra.mxu0 %v361_v14 }
  0x1c   :  { %340 = vmatprep.subr.bf16.mxu0 %v362_v15 }
  0x1f   :  { %341 = vmatpush3.bf16.msra.mxu0 %v363_v16 }
  0x22   :  { %205 = vmatmul.mubr.bf16.vlgmr.msra.gmra.mrb[0].mxu0 %v364_v17 }
  0xf5   :  { %v342_v19 = vpop.f32.mrb[0].mxu0 }
  0xf6   :  { %v343_v20 = vpop.f32.mrb[1].mxu0 }
  0xf7   :  { %v344_v22 = vadd.f32 %v343_v20, %v342_v19  ;;  %v345_v23 = vpop.f32.mrb[2].mxu0 }
  0xf8   :  { %v346_v25 = vpop.f32.mrb[3].mxu0 }
  0xf9   :  { %v229_v26 = vadd.f32 %v344_v22, %v310_v21  ;;  %v347_v27 = vadd.f32 %v346_v25, %v345_v23 }
  0xfb   :  { %v230_v28 = vadd.f32 %v347_v27, %v310_v21  ;;  %v235_v29 = vadd.f32 %v319_v24, %v229_v26 }
  0xfd   :  { %237 = vadd.xlane.f32.xlu0 %v235_v29  ;;  %v236_v31 = vadd.f32 %v320_v30, %v230_v28 }
 0x101   :  { %239 = vadd.xlane.f32.xlu0 %v236_v31 }
 0x18a   :  { %v238_v32 = vpop.xlane.xlu0 %237 }
 0x18b   :  { %v242_v33 = vmul.f32 0.0078125, %v238_v32 }
 0x18d   :  { %v244_v34 = vsub.f32 %v235_v29, %v242_v33 }
 0x18e   :  { %v240_v35 = vpop.xlane.xlu0 %239 }
 0x18f   :  { %v243_v36 = vmul.f32 0.0078125, %v240_v35  ;;  %v246_v37 = vmul.f32 %v244_v34, %v244_v34 }
 0x191   :  { %v245_v38 = vsub.f32 %v236_v31, %v243_v36  ;;  %248 = vadd.xlane.f32.xlu1 %v246_v37 }
 0x193   :  { %v247_v39 = vmul.f32 %v245_v38, %v245_v38 }
 0x195   :  { %250 = vadd.xlane.f32.xlu1 %v247_v39 }
 0x21e   :  { %v249_v40 = vpop.xlane.xlu1 %248 }
 0x21f   :  { %v252_v41 = vmul.f32 0.0078125, %v249_v40 }
 0x221   :  { %v254_v42 = vadd.f32 1e-05, %v252_v41 }
 0x222   :  { %v251_v43 = vpop.xlane.xlu1 %250 }
 0x223   :  { %367 = vrsqrt.f32 %v254_v42  ;;  %v253_v44 = vmul.f32 0.0078125, %v251_v43 }
 0x225   :  { %v255_v45 = vadd.f32 1e-05, %v253_v44 }
 0x227   :  { %369 = vrsqrt.f32 %v255_v45 }
 0x22d   :  { %v368_v46 = vpop.eup %367 }
 0x22e   :  { %v258_v47 = vmul.f32 %v368_v46, %v244_v34 }
 0x230   :  { %v267_v50 = vmul.f32 %v311_v48, %v258_v47 }
 0x231   :  { %v370_v49 = vpop.eup %369 }
 0x232   :  { %v259_v51 = vmul.f32 %v370_v49, %v245_v38  ;;  %v276_v54 = vadd.f32 %v312_v52, %v267_v50 }
 0x234   :  { %v268_v53 = vmul.f32 %v311_v48, %v259_v51 }
 0x236   :  { %v277_v55 = vadd.f32 %v312_v52, %v268_v53 }
 0x238   :  { %v324_v56 = vpack.c.bf16 %v277_v55, %v276_v54 }
 0x23a   :  { %325 = vst [vmem:[%s481_s6] sm:$0xff] %v324_v56  }

// kernel: transformer_comment_gen.46
= control target key start
LH: loop header
LB: loop body
LE: loop exit
PB: predicated region body
PF: predicated region fallthrough
CT: control target
= control target key end

     0   :  { %v270_v1 = vmov 0   ;;  %v191_v18 = vlaneseq  ;;  %s351_s1 = inlined_call_operand.vmem [shape: bf16[128,256], index: 1, kind: input, shape index: {}]   ;;  %s352_s0 = inlined_call_operand.vmem [shape: bf16[16,128], index: 0, kind: input, shape index: {}]   ;;  %s353_s2 = inlined_call_operand.vmem [shape: f32[1,256], index: 2, kind: input, shape index: {}]   ;;  %s354_s3 = inlined_call_operand.vmem [shape: bf16[16,256], index: 3, kind: output, shape index: {}]  }
   0x1   :  { %v245_v0 = vld [vmem:[%s351_s1 + $0x4] ss:$8 sps:$4 sm:$0xff]   ;;  %163 = vmatprep.mubr.bf16.mxu0 %v270_v1  ;;  %v247_v2 = vld [vmem:[%s351_s1] ss:$8 sps:$4 sm:$0xff]   ;;  %v248_v3 = vld [vmem:[%s351_s1 + $0x14] ss:$8 sps:$4 sm:$0xff]  }
   0x2   :  { %131 = vmatprep.subr.bf16.mxu0 %v245_v0  ;;  %v250_v4 = vld [vmem:[%s351_s1 + $0x10] ss:$8 sps:$4 sm:$0xff]   ;;  %v251_v5 = vld [vmem:[%s351_s1 + $0x24] ss:$8 sps:$4 sm:$0xff]   ;;  %v253_v6 = vld [vmem:[%s351_s1 + $0x20] ss:$8 sps:$4 sm:$0xff]  }
   0x3   :  { %132 = vmatpush1.bf16.msra.mxu0 %v247_v2  ;;  %v254_v7 = vld [vmem:[%s351_s1 + $0x34] ss:$8 sps:$4 sm:$0xff]   ;;  %v256_v8 = vld [vmem:[%s351_s1 + $0x30] ss:$8 sps:$4 sm:$0xff]   ;;  %v257_v9 = vld [vmem:[%s351_s1 + $0x44] ss:$8 sps:$4 sm:$0xff]  }
   0x4   :  { %133 = vmatprep.subr.bf16.mxu0 %v248_v3  ;;  %v259_v10 = vld [vmem:[%s351_s1 + $0x40] ss:$8 sps:$4 sm:$0xff]   ;;  %v260_v11 = vld [vmem:[%s351_s1 + $0x54] ss:$8 sps:$4 sm:$0xff]   ;;  %v262_v12 = vld [vmem:[%s351_s1 + $0x50] ss:$8 sps:$4 sm:$0xff]  }
   0x5   :  { %v263_v13 = vld [vmem:[%s351_s1 + $0x64] ss:$8 sps:$4 sm:$0xff]   ;;  %v265_v14 = vld [vmem:[%s351_s1 + $0x60] ss:$8 sps:$4 sm:$0xff]   ;;  %v266_v15 = vld [vmem:[%s351_s1 + $0x74] ss:$8 sps:$4 sm:$0xff]  }
   0x6   :  { %v268_v16 = vld [vmem:[%s351_s1 + $0x70] ss:$8 sps:$4 sm:$0xff]   ;;  %v269_v17 = vld [vmem:[%s352_s0] sm:$0xff]   ;;  %v192_v19 = vshrl.u32 %v191_v18, 7 }
   0x7   :  { %134 = vmatpush1.bf16.msra.mxu0 %v250_v4  ;;  %v189_v21 = vld [vmem:[%s353_s2] sm:$0x3] }
   0x8   :  { %135 = vmatprep.subr.bf16.mxu0 %v251_v5  ;;  %v193_v20 = vsub.s32 0, %v192_v19  ;;  %v197_v22 = vsub.s32 1, %v192_v19 }
   0xa   :  { %v194_v23 = vrot.slane %v189_v21, %v193_v20  ;;  %v198_v24 = vrot.slane %v189_v21, %v197_v22 }
   0xb   :  { %136 = vmatpush1.bf16.msra.mxu0 %v253_v6 }
   0xc   :  { %137 = vmatprep.subr.bf16.mxu0 %v254_v7 }
   0xf   :  { %138 = vmatpush1.bf16.msra.mxu0 %v256_v8 }
  0x10   :  { %139 = vmatprep.subr.bf16.mxu0 %v257_v9 }
  0x13   :  { %140 = vmatpush1.bf16.msra.mxu0 %v259_v10 }
  0x14   :  { %141 = vmatprep.subr.bf16.mxu0 %v260_v11 }
  0x17   :  { %142 = vmatpush1.bf16.msra.mxu0 %v262_v12 }
  0x18   :  { %143 = vmatprep.subr.bf16.mxu0 %v263_v13 }
  0x1b   :  { %144 = vmatpush1.bf16.msra.mxu0 %v265_v14 }
  0x1c   :  { %145 = vmatprep.subr.bf16.mxu0 %v266_v15 }
  0x1f   :  { %146 = vmatpush1.bf16.msra.mxu0 %v268_v16 }
  0x22   :  { %164 = vmatmul.mubr.bf16.vlgmr.msra.gmra.mrb[0].mxu0 %v269_v17 }
  0xf5   :  { %v165_v25 = vpop.f32.mrb[0].mxu0 }
  0xf6   :  { %v201_v26 = vadd.f32 %v194_v23, %v165_v25  ;;  %v167_v27 = vpop.f32.mrb[1].mxu0 }
  0xf7   :  { %v202_v28 = vadd.f32 %v198_v24, %v167_v27  ;;  %v169_v29 = vpop.f32.mrb[2].mxu0 }
  0xf8   :  { %v203_v30 = vadd.f32 %v194_v23, %v169_v29  ;;  %v171_v31 = vpop.f32.mrb[3].mxu0 }
  0xf9   :  { %v242_v32 = vpack.c.bf16 %v202_v28, %v201_v26  ;;  %v204_v33 = vadd.f32 %v198_v24, %v171_v31 }
  0xfb   :  { %217 = vst [vmem:[%s354_s3] sm:$0xff] %v242_v32  ;;  %v243_v34 = vpack.c.bf16 %v204_v33, %v203_v30 }
  0xfd   :  { %218 = vst [vmem:[%s354_s3 + $0x8] sm:$0xff] %v243_v34 }

// kernel: transformer_comment_gen.43
= control target key start
LH: loop header
LB: loop body
LE: loop exit
PB: predicated region body
PF: predicated region fallthrough
CT: control target
= control target key end

     0   :  { %s799_s12 = smov 0   ;;  %s801_s13 = smov 0   ;;  %s863_s0 = inlined_call_operand.vmem [shape: bf16[8,16,32], index: 0, kind: input, shape index: {}]   ;;  %s864_s1 = inlined_call_operand.vmem [shape: bf16[8,16,32], index: 1, kind: input, shape index: {}]   ;;  %s865_s2 = inlined_call_operand.vmem [shape: bf16[8,16,32], index: 2, kind: input, shape index: {}]   ;;  %s866_s3 = inlined_call_operand.vmem [shape: bf16[8,16,32], index: 3, kind: output, shape index: {}]  }
   0x1   :  { %s803_s14 = smov 0  }
   0x2 LB: > { %s32_s15 = sadd.s32 1, %s769_s13  ;;  %p666_p0 = scmp.ge.s32.totalorder %s773_s14, 1  ;;  %s773_s14 = sphi %s803_s14, %s13_s14   ;;  %s769_s13 = sphi %s801_s13, %s868_s13   ;;  %s765_s12 = sphi %s799_s12, %s867_s12  }
   0x3   : > { %p34_p1 = scmp.ge.s32.totalorder %s32_s15, 8  ;;  %p199_p2 = scmp.lt.s32.totalorder %s773_s14, 9 }
   0x5   : > { %s870_s15 = smov (%p34_p1, %s32_s15), 0  ;;  %p200_p3 = pnand %p666_p0, %p199_p2 }
   0x6   : > { %p250_p4 = scmp.lt.s32.totalorder (!%p200_p3), %s765_s12, 7  ;;  %vm299_vm0 = vcmask (!%p200_p3), 261120   ;;  %v775_v0 = vmov (!%p200_p3), 0.0   ;;  %vm776_vm1 = vmmov (!%p200_p3), 0   ;;  %vm294_vm2 = vcmask (!%p200_p3), 7168  }
   0x7   : > { %203 = sbr.rel (%p200_p3) target bundleno = 828 (0x33c), region = 32  ;;  %694 = vmatprep.subr.bf16.mxu0 (!%p200_p3), %v775_v0  ;;  %300 = vst.msk [vmem:[#allocation4] sm:$0xff] (!%p200_p3), %vm299_vm0, %v775_v0  ;;  %301 = vst.msk [vmem:[#allocation4 + $0x8] sm:$0xff] (!%p200_p3), %vm299_vm0, %v775_v0  ;;  %696 = vmatprep.mubr.msk.bf16.mxu0 (!%p200_p3), %vm776_vm1, %v775_v0  ;;  %v777_v4 = vmov (!%p200_p3), -1e+30   ;;  %v365_v5 = vlaneseq (!%p200_p3)  ;;  %vm385_vm7 = vcmask (!%p200_p3), 130048  }
   0x8   : > { %700 = vmatprep.subr.bf16.mxu1 (!%p200_p3), %v775_v0  ;;  %702 = vmatprep.mubr.msk.bf16.mxu1 (!%p200_p3), %vm776_vm1, %v775_v0  ;;  %295 = vst.msk [vmem:[#allocation2] sm:$0xff] (!%p200_p3), %vm294_vm2, %v777_v4  ;;  %296 = vst.msk [vmem:[#allocation2 + $0x8] sm:$0xff] (!%p200_p3), %vm294_vm2, %v777_v4  ;;  %v778_v17 = vmov (!%p200_p3), 0   ;;  %vm533_vm9 = vcmask (!%p200_p3), 257024  }
   0x9   : > { %297 = vst.msk [vmem:[#allocation3] sm:$0xff] (!%p200_p3), %vm294_vm2, %v775_v0  ;;  %298 = vst.msk [vmem:[#allocation3 + $0x8] sm:$0xff] (!%p200_p3), %vm294_vm2, %v775_v0  ;;  %v371_v6 = vshrl.u32 (!%p200_p3), %v365_v5, 7  ;;  %v366_v7 = vand.u32 (!%p200_p3), 127, %v365_v5  ;;  %734 = vset.pattern.permute.xlu1 (!%p200_p3), %v778_v17  ;;  %735 = vset.pattern.permute.xlu0 (!%p200_p3), %v778_v17 }
   0xb   : > { %v372_v8 = vadd.s32 (!%p200_p3), 8, %v371_v6  ;;  %vm376_vm3 = vcmp.gt.s32.totalorder (!%p200_p3), %v366_v7, %v371_v6  ;;  %vm378_vm4 = vcmp.ge.s32.totalorder (!%p200_p3), %v366_v7, 8 }
   0xc   : > { %vm379_vm6 = vmor (!%p200_p3), %vm376_vm3, %vm378_vm4 }
   0xd   : > { %vm377_vm5 = vcmp.gt.s32.totalorder (!%p200_p3), %v366_v7, %v372_v8 }
   0xe   : > { %s872_s12 = smov (!%p250_p4, %s765_s12), 7  ;;  %vm380_vm8 = vmor %vm377_vm5, %vm378_vm4  ;;  %v431_v54 = vld [vmem:[#allocation4] sm:$0xff]  ;;  %v432_v56 = vld [vmem:[#allocation4 + $0x8] sm:$0xff] }
   0xf   : > { %s819_s16 = sshll.u32 %s872_s12, 3  ;;  %v383_v18 = vld [vmem:[#allocation2] sm:$0xff]  ;;  %v384_v21 = vld [vmem:[#allocation2 + $0x8] sm:$0xff] }
  0x10   : > { %s267_s19 = scalar_lea.vmem %s864_s1, %s819_s16  ;;  %s257_s22 = scalar_lea.vmem %s863_s0, %s819_s16  ;;  %v416_v42 = vld [vmem:[#allocation3] sm:$0xff]  ;;  %v417_v45 = vld [vmem:[#allocation3 + $0x8] sm:$0xff] }
  0x11   : > { %v736_v1 = vld [vmem:[%s267_s19] sm:$0xff]   ;;  %s277_s25 = scalar_lea.vmem %s865_s2, %s819_s16  ;;  %s287_s28 = scalar_lea.vmem %s866_s3, %s819_s16 }
  0x12   : > { %v321_v2 = vsel %vm299_vm0, %v736_v1, 0  ;;  %v737_v3 = vld [vmem:[%s257_s22] sm:$0xff]  }
  0x13   : > { %695 = vmatpush3.bf16.xpose.msra.mxu0 %v321_v2  ;;  %v738_v26 = vld [vmem:[%s277_s25] sm:$0xff]  }
  0x14   : > { %701 = vmatpush3.bf16.msra.mxu1 %v738_v26 }
  0x1a   : > { %697 = vmatmul.mubr.msk.bf16.vlgmr.msra.gmra.mrb[0].mxu0 %vm299_vm0, %v737_v3 }
  0xed   : > { %v357_v9 = vpop.f32.mrb[0].mxu0 }
  0xee   : > { %v381_v10 = vsel %vm379_vm6, -1e+30, %v357_v9  ;;  %v698_v11 = vpop.f32.mrb[1].mxu0 }
  0xef   : > { %v360_v12 = vpop.f32.mrb[2].mxu0  ;;  %v386_v13 = vsel %vm385_vm7, %v381_v10, -inf }
  0xf0   : > { %v382_v14 = vsel %vm380_vm8, -1e+30, %v360_v12  ;;  %387 = vmax.xlane.f32.xlu0 %v386_v13  ;;  %v699_v15 = vpop.f32.mrb[3].mxu0 }
  0xf1   : > { %v389_v16 = vsel %vm385_vm7, %v382_v14, -inf }
  0xf4   : > { %390 = vmax.xlane.f32.xlu0 %v389_v16 }
 0x17d   : > { %v388_v19 = vpop.xlane.xlu0 %387 }
 0x17e   : > { %v392_v20 = vmax.f32 %v383_v18, %v388_v19 }
 0x180   : > { %v394_v22 = vsub.f32 %v383_v18, %v392_v20  ;;  %502 = vst.msk [vmem:[#allocation2] sm:$0xff] %vm294_vm2, %v392_v20  ;;  %402 = vperm.xlu1 %734, %v392_v20  }
 0x181   : > { %v391_v23 = vpop.xlane.xlu0 %390 }
 0x182   : > { %v393_v24 = vmax.f32 %v384_v21, %v391_v23  ;;  %v396_v39 = vmul.f32 1.442695, %v394_v22 }
 0x184   : > { %v395_v25 = vsub.f32 %v384_v21, %v393_v24  ;;  %503 = vst.msk [vmem:[#allocation2 + $0x8] sm:$0xff] %vm294_vm2, %v393_v24  ;;  %407 = vperm.xlu1 %734, %v393_v24  }
 0x186   : > { %v398_v38 = vmul.f32 1.442695, %v395_v25 }
 0x1ff   : > { %v403_v27 = vpop.permute.xlu1 %402 }
 0x200   : > { %v410_v28 = vsub.f32 %v381_v10, %v403_v27 }
 0x202   : > { %v412_v29 = vmul.f32 1.442695, %v410_v28 }
 0x203   : > { %v408_v30 = vpop.permute.xlu1 %407 }
 0x204   : > { %739 = vpow2.f32 %v412_v29  ;;  %v411_v31 = vsub.f32 %v382_v14, %v408_v30 }
 0x206   : > { %v414_v32 = vmul.f32 1.442695, %v411_v31 }
 0x208   : > { %741 = vpow2.f32 %v414_v32 }
 0x209   : > { %743 = vpow2.f32 %v398_v38 }
 0x20a   : > { %745 = vpow2.f32 %v396_v39 }
 0x20e   : > { %v740_v33 = vpop.eup %739 }
 0x20f   : > { %v420_v34 = vsel %vm385_vm7, %v740_v33, 0.0 }
 0x210   : > { %421 = vadd.xlane.f32.xlu0 %v420_v34 }
 0x212   : > { %v742_v35 = vpop.eup %741 }
 0x213   : > { %v423_v36 = vsel %vm385_vm7, %v742_v35, 0.0  ;;  %v445_v37 = vpack.c.bf16 %v742_v35, %v740_v33  ;;  %v744_v40 = vpop.eup %743 }
 0x214   : > { %424 = vadd.xlane.f32.xlu1 %v423_v36  ;;  %v746_v41 = vpop.eup %745  ;;  %v419_v47 = vmul.f32 %v744_v40, %v417_v45 }
 0x215   : > { %703 = vmatmul.mubr.msk.bf16.vlgmr.msra.gmra.mrb[0].mxu1 %vm385_vm7, %v445_v37  ;;  %v418_v43 = vmul.f32 %v746_v41, %v416_v42 }
 0x225   : > { %440 = vperm.xlu1 %734, %v744_v40  }
 0x226   : > { %435 = vperm.xlu0 %735, %v746_v41  }
 0x29d   : > { %v422_v44 = vpop.xlane.xlu0 %421 }
 0x29e   : > { %v426_v46 = vadd.f32 %v422_v44, %v418_v43 }
 0x2a0   : > { %429 = vst.msk [vmem:[#allocation3] sm:$0xff] %vm294_vm2, %v426_v46 }
 0x2a1   : > { %v425_v48 = vpop.xlane.xlu1 %424 }
 0x2a2   : > { %v427_v49 = vadd.f32 %v425_v48, %v419_v47 }
 0x2a4   : > { %430 = vst.msk [vmem:[#allocation3 + $0x8] sm:$0xff] %vm294_vm2, %v427_v49 }
 0x2a5   : > { %v436_v55 = vpop.permute.xlu0 %435  ;;  %v441_v57 = vpop.permute.xlu1 %440 }
 0x2a6   : > { %v443_v58 = vmul.f32 %v436_v55, %v431_v54  ;;  %v444_v60 = vmul.f32 %v441_v57, %v432_v56 }
 0x2a7   : > { %v507_v50 = vld [vmem:[#allocation3] sm:$0xff] }
 0x2a8   : > { %747 = vrcp.f32 %v507_v50 }
 0x2ab   : > { %v508_v51 = vld [vmem:[#allocation3 + $0x8] sm:$0xff] }
 0x2ac   : > { %749 = vrcp.f32 %v508_v51 }
 0x2b2   : > { %v748_v52 = vpop.eup %747 }
 0x2b3   : > { %515 = vperm.xlu0 %735, %v748_v52  }
 0x2b6   : > { %v750_v53 = vpop.eup %749 }
 0x2b7   : > { %520 = vperm.xlu0 %735, %v750_v53  }
 0x2e8   : > { %v491_v59 = vpop.f32.mrb[0].mxu1 }
 0x2e9   : > { %v498_v61 = vadd.f32 %v491_v59, %v443_v58  ;;  %v704_v62 = vpop.f32.mrb[1].mxu1 }
 0x2ea   : > { %v494_v63 = vpop.f32.mrb[2].mxu1 }
 0x2eb   : > { %500 = vst.msk [vmem:[#allocation4] sm:$0xff] %vm299_vm0, %v498_v61  ;;  %v499_v0 = vadd.f32 %v494_v63, %v444_v60  ;;  %v705_v1 = vpop.f32.mrb[3].mxu1 }
 0x2ed   : > { %501 = vst.msk [vmem:[#allocation4 + $0x8] sm:$0xff] %vm299_vm0, %v499_v0 }
 0x2f2   : > { %v511_v2 = vld [vmem:[#allocation4] sm:$0xff] }
 0x2f4   : > { %v512_v6 = vld [vmem:[#allocation4 + $0x8] sm:$0xff] }
 0x332   : > { %v516_v3 = vpop.permute.xlu0 %515 }
 0x333   : > { %v523_v4 = vmul.f32 %v516_v3, %v511_v2 }
 0x335   : > { %v688_v5 = vpack.c.bf16 %v523_v4, %v523_v4 }
 0x336   : > { %v521_v7 = vpop.permute.xlu0 %520 }
 0x337   : > { %534 = vst.msk [vmem:[%s287_s28] sm:$0xf] %vm533_vm9, %v688_v5  ;;  %v524_v8 = vmul.f32 %v521_v7, %v512_v6 }
 0x339   : > { %v689_v9 = vpack.c.bf16 %v524_v8, %v524_v8 }
 0x33b   : > { %535 = vst.msk [vmem:[%s287_s28 + $0x4] sm:$0xf] %vm533_vm9, %v689_v9 }
 0x33c PF: > { %s13_s14 = sadd.s32 1, %s773_s14   ;;  %s867_s12 = smov %s769_s13 }
 0x33d   : > { %p10_p5 = scmp.ge.s32.totalorder %s13_s14, 10   ;;  %s868_s13 = smov %s870_s15 }
 0x33f   :  { %12 = sbr.rel (!%p10_p5) target bundleno = 2 (0x2), region = 76 }

// kernel: transformer_comment_gen.45
= control target key start
LH: loop header
LB: loop body
LE: loop exit
PB: predicated region body
PF: predicated region fallthrough
CT: control target
= control target key end

     0   :  { %v227_v0 = vmov 0.0   ;;  %vm228_vm0 = vmmov 0   ;;  %s282_s1 = inlined_call_operand.vmem [shape: bf16[128,128], index: 1, kind: input, shape index: {}]   ;;  %s283_s0 = inlined_call_operand.vmem [shape: bf16[16,128], index: 0, kind: input, shape index: {}]   ;;  %s284_s2 = inlined_call_operand.vmem [shape: f32[1,128], index: 2, kind: input, shape index: {}]   ;;  %s285_s3 = inlined_call_operand.vmem [shape: bf16[16,128], index: 3, kind: output, shape index: {}]  }
   0x1   :  { %196 = vmatprep.subr.bf16.mxu0 %v227_v0  ;;  %v218_v1 = vld [vmem:[%s282_s1] sm:$0xff]   ;;  %212 = vmatprep.mubr.msk.bf16.mxu0 %vm228_vm0, %v227_v0  ;;  %v219_v2 = vld [vmem:[%s282_s1 + $0x8] sm:$0xff]   ;;  %v220_v3 = vld [vmem:[%s282_s1 + $0x10] sm:$0xff]  }
   0x2   :  { %197 = vmatpush3.bf16.msra.mxu0 %v218_v1  ;;  %v221_v4 = vld [vmem:[%s282_s1 + $0x18] sm:$0xff]   ;;  %v222_v5 = vld [vmem:[%s282_s1 + $0x20] sm:$0xff]   ;;  %v223_v6 = vld [vmem:[%s282_s1 + $0x28] sm:$0xff]  }
   0x3   :  { %198 = vmatprep.subr.bf16.mxu0 %v227_v0  ;;  %v224_v7 = vld [vmem:[%s282_s1 + $0x30] sm:$0xff]   ;;  %v225_v8 = vld [vmem:[%s282_s1 + $0x38] sm:$0xff]   ;;  %v226_v9 = vld [vmem:[%s283_s0] sm:$0xff]  }
   0x4   :  { %v177_v11 = vld [vmem:[%s284_s2] ss:$0 sm:$0xff] }
   0x6   :  { %199 = vmatpush3.bf16.msra.mxu0 %v219_v2 }
   0x7   :  { %200 = vmatprep.subr.bf16.mxu0 %v227_v0 }
   0xa   :  { %201 = vmatpush3.bf16.msra.mxu0 %v220_v3 }
   0xb   :  { %202 = vmatprep.subr.bf16.mxu0 %v227_v0 }
   0xe   :  { %203 = vmatpush3.bf16.msra.mxu0 %v221_v4 }
   0xf   :  { %204 = vmatprep.subr.bf16.mxu0 %v227_v0 }
  0x12   :  { %205 = vmatpush3.bf16.msra.mxu0 %v222_v5 }
  0x13   :  { %206 = vmatprep.subr.bf16.mxu0 %v227_v0 }
  0x16   :  { %207 = vmatpush3.bf16.msra.mxu0 %v223_v6 }
  0x17   :  { %208 = vmatprep.subr.bf16.mxu0 %v227_v0 }
  0x1a   :  { %209 = vmatpush3.bf16.msra.mxu0 %v224_v7 }
  0x1b   :  { %210 = vmatprep.subr.bf16.mxu0 %v227_v0 }
  0x1e   :  { %211 = vmatpush3.bf16.msra.mxu0 %v225_v8 }
  0x21   :  { %213 = vmatmul.mubr.bf16.vlgmr.msra.gmra.mrb[0].mxu0 %v226_v9 }
  0xf4   :  { %v129_v10 = vpop.f32.mrb[0].mxu0 }
  0xf5   :  { %v214_v12 = vpop.f32.mrb[1].mxu0  ;;  %v152_v14 = vadd.f32 %v177_v11, %v129_v10 }
  0xf6   :  { %v132_v13 = vpop.f32.mrb[2].mxu0 }
  0xf7   :  { %v153_v15 = vadd.f32 %v177_v11, %v132_v13  ;;  %v215_v16 = vpop.f32.mrb[3].mxu0 }
  0xf9   :  { %v185_v17 = vpack.c.bf16 %v153_v15, %v152_v14 }
  0xfb   :  { %186 = vst [vmem:[%s285_s3] sm:$0xff] %v185_v17  }

// kernel: transformer_comment_gen.61
= control target key start
LH: loop header
LB: loop body
LE: loop exit
PB: predicated region body
PF: predicated region fallthrough
CT: control target
= control target key end

     0   :  { %v250_v1 = vmov 0.0   ;;  %vm251_vm0 = vmmov 0   ;;  %s317_s0 = inlined_call_operand.vmem [shape: bf16[16,128], index: 0, kind: input, shape index: {}]   ;;  %s318_s1 = inlined_call_operand.vmem [shape: bf16[128,128], index: 1, kind: input, shape index: {}]   ;;  %s319_s2 = inlined_call_operand.vmem [shape: f32[1,128], index: 2, kind: input, shape index: {}]   ;;  %s320_s3 = inlined_call_operand.hbm [shape: f32[16,128], index: 3, kind: output, shape index: {}]  }
   0x1   :  { %v217_v0 = vld [vmem:[%s318_s1] sm:$0xff]   ;;  %192 = vmatprep.subr.bf16.mxu0 %v250_v1  ;;  %v218_v2 = vld [vmem:[%s318_s1 + $0x8] sm:$0xff]   ;;  %208 = vmatprep.mubr.msk.bf16.mxu0 %vm251_vm0, %v250_v1  ;;  %v219_v3 = vld [vmem:[%s318_s1 + $0x10] sm:$0xff]  }
   0x2   :  { %193 = vmatpush3.bf16.msra.mxu0 %v217_v0 }
   0x3   :  { %194 = vmatprep.subr.bf16.mxu0 %v250_v1 }
   0x6   :  { %195 = vmatpush3.bf16.msra.mxu0 %v218_v2 }
   0x7   :  { %196 = vmatprep.subr.bf16.mxu0 %v250_v1 }
   0x8   :  { %8 = vsyncpa [#allocation4], 0  ;;  %v220_v4 = vld [vmem:[%s318_s1 + $0x18] sm:$0xff]   ;;  %v221_v5 = vld [vmem:[%s318_s1 + $0x20] sm:$0xff]   ;;  %s252_s5 = smov [#allocation3]  }
   0x9   :  { %v222_v6 = vld [vmem:[%s318_s1 + $0x28] sm:$0xff]   ;;  %v223_v7 = vld [vmem:[%s318_s1 + $0x30] sm:$0xff]   ;;  %v224_v8 = vld [vmem:[%s318_s1 + $0x38] sm:$0xff]   ;;  %s162_s6 = sshll.u32 %s252_s5, 4  ;;  %s163_s6 = int_to_ptr.vmem [resolvable:$true] %s162_s6 }
   0xa   :  { %197 = vmatpush3.bf16.msra.mxu0 %v219_v3  ;;  %v225_v9 = vld [vmem:[%s317_s0] sm:$0xff]   ;;  %s226_s1 = scalar_lea.vmem %s163_s6, 256  ;;  %p231_p1 = scmp.lt.s32.totalorder %s163_s6, %s163_s6 }
   0xb   :  { %198 = vmatprep.subr.bf16.mxu0 %v250_v1  ;;  %v182_v10 = vld [vmem:[%s319_s2] ss:$0 sm:$0xff]  ;;  %p227_p0 = scmp.ne.s32.totalorder %s163_s6, %s226_s1  ;;  %p232_p2 = scmp.lt.s32.totalorder %s226_s1, %s226_s1 }
   0xd   :  { %p233_p3 = por %p232_p2, %p231_p1 }
   0xe   :  { %199 = vmatpush3.bf16.msra.mxu0 %v220_v4 }
   0xf   :  { %200 = vmatprep.subr.bf16.mxu0 %v250_v1  ;;  %p234_p4 = pnand %p233_p3, %p227_p0 }
  0x12   :  { %201 = vmatpush3.bf16.msra.mxu0 %v221_v5 }
  0x13   :  { %202 = vmatprep.subr.bf16.mxu0 %v250_v1 }
  0x16   :  { %203 = vmatpush3.bf16.msra.mxu0 %v222_v6 }
  0x17   :  { %204 = vmatprep.subr.bf16.mxu0 %v250_v1 }
  0x1a   :  { %205 = vmatpush3.bf16.msra.mxu0 %v223_v7 }
  0x1b   :  { %206 = vmatprep.subr.bf16.mxu0 %v250_v1 }
  0x1e   :  { %207 = vmatpush3.bf16.msra.mxu0 %v224_v8 }
  0x21   :  { %209 = vmatmul.mubr.bf16.vlgmr.msra.gmra.mrb[0].mxu0 %v225_v9 }
  0xf4   :  { %v130_v11 = vpop.f32.mrb[0].mxu0 }
  0xf5   :  { %v153_v12 = vadd.f32 %v182_v10, %v130_v11  ;;  %v210_v13 = vpop.f32.mrb[1].mxu0 }
  0xf6   :  { %v133_v14 = vpop.f32.mrb[2].mxu0 }
  0xf7   :  { %155 = vst [vmem:[#allocation3] sm:$0xff] %v153_v12  ;;  %v154_v15 = vadd.f32 %v182_v10, %v133_v14  ;;  %v211_v16 = vpop.f32.mrb[3].mxu0 }
  0xf9   :  { %156 = vst [vmem:[#allocation3 + $0x8] sm:$0xff] %v154_v15 }
  0xfa   :  { %237 = shalt.err (!%p234_p4)
}
  0xfb   :  { %s238_s7 = scalar_lea.hbm %s320_s3, 256 }
  0xfc   :  { %p239_p5 = scmp.ne.s32.totalorder %s320_s3, %s238_s7  ;;  %p242_p6 = scmp.lt.u32.totalorder %s238_s7, %s320_s3 }
  0xfe   :  { %p244_p7 = pnand %p242_p6, %p239_p5 }
 0x100   :  { %247 = shalt.err (!%p244_p7)
}
 0x101   :  { %s253_s12 = smov 128   ;;  %s254_s13 = smov 8  }
 0x102   :  { %168 = dma.vmem_to_hbm [thread:$0]  %s163_s6, 256, %s320_s3, [#allocation4], %s253_s12, %s253_s12, %s254_s13  }
 0x103   :  { %248 = dma.done.wait [#allocation4], 256  }
 0x104   :  { %249 = vsyncadd [#allocation4], 4294967040 }
 0x105   :  { %172 = vsyncpa [#allocation4], 1 }

</bundles_post_ra>
